<compile_context>
chip_gen: v6e
topology: v6e:2x2x1
jax: 0.10.0
libtpu: 0.0.40
codegen_flags: <defaults>
</compile_context>

<pallas_src>
import functools

import jax
import jax.numpy as jnp
from jax import lax
from jax.experimental import pallas as pl
from jax.experimental.pallas import tpu as pltpu


# --------------------------------- fused kernel ---------------------------------


def _fused_mlp_kernel(xt_ref, xm_ref, xb_ref,
                      w1_ref, b1_ref, wc_ref, bc_ref, w2_ref, b2_ref,
                      o_ref, *, tile_rows, width, gelu_approximate):
    """One (batch, row-tile) step of fc1 -> dwconv3x3 -> GELU -> fc2.

    Token-major blocks (tokens are row-major: n = h*W + w):
      xt_ref: (1, W,     C_in)   image row above the tile (clamped; zero-masked at the top)
      xm_ref: (1, tH*W,  C_in)   the tile's tH rows of tokens
      xb_ref: (1, W,     C_in)   image row below the tile (clamped; zero-masked at the bottom)
      w1_ref: (C_in, hidden) bf16    b1_ref: (1, hidden) f32
      wc_ref: (3, 3, hidden) f32     bc_ref: (1, hidden) f32
      w2_ref: (hidden, out_f) bf16   b2_ref: (1, out_f) f32
      o_ref : (1, tH*W, out_f)
    """
    tH, W = tile_rows, width
    r = pl.program_id(1)
    nr = pl.num_programs(1)
    hidden = w1_ref.shape[1]

    # ---- assemble ((tH+2)*W, C_in) token slab with 1-row halos; single cast to bf16 for MXU.
    xh = jnp.concatenate([xt_ref[0], xm_ref[0], xb_ref[0]], axis=0)
    xh = xh.astype(jnp.bfloat16)

    # ---- fc1: bf16 x bf16 -> f32 accumulate (halo rows recomputed: 2/(tH+2) extra FLOPs).
    h = jnp.dot(xh, w1_ref[...], preferred_element_type=jnp.float32)
    h = h + b1_ref[...]                                   # f32 bias
    h = h.reshape(tH + 2, W, hidden)                      # leading-dim split (W % 8 == 0): free

    # ---- zero the halo rows outside the image -> reproduces the conv's zero padding.
    rows = lax.broadcasted_iota(jnp.int32, (tH + 2, 1, 1), 0)
    outside = jnp.logical_or(jnp.logical_and(rows == 0, r == 0),
                             jnp.logical_and(rows == tH + 1, r == nr - 1))
    h = jnp.where(outside, 0.0, h)

    # ---- 3x3 depthwise conv.  Column (kw) shifts via pltpu.roll (XLU, sublane axis) + edge
    #      mask instead of a width-padded copy and misaligned slices; row (kh) shifts are
    #      cheap static slices along the leading axis.
    cols = lax.broadcasted_iota(jnp.int32, (1, W, 1), 1)
    h_m1 = jnp.where(cols == 0, 0.0, pltpu.roll(h, shift=1, axis=1))          # h[:, x-1, :]
    h_p1 = jnp.where(cols == W - 1, 0.0, pltpu.roll(h, shift=W - 1, axis=1))  # h[:, x+1, :]
    shifted = (h_m1, h, h_p1)                                                 # kw = 0, 1, 2

    wc = wc_ref[...]                                       # (3, 3, hidden) f32 (pre-cast on host)
    acc = jnp.zeros((tH, W, hidden), jnp.float32)
    for kh in range(3):                                    # statically unrolled 9-tap MAC
        for kw in range(3):
            acc = acc + shifted[kw][kh:kh + tH] * wc[kh, kw, :]
    acc = acc + bc_ref[...]

    # tanh GELU runs on the (idle) EUP slot; erf polynomial stays on the saturated VALU.
    a = jax.nn.gelu(acc, approximate=gelu_approximate)

    # ---- fc2: bf16 x bf16 -> f32 accumulate; leading-dim merge (free) then store.
    a2 = a.reshape(tH * W, hidden).astype(jnp.bfloat16)
    y = jnp.dot(a2, w2_ref[...], preferred_element_type=jnp.float32)
    y = y + b2_ref[...]
    o_ref[0] = y.astype(o_ref.dtype)


# --------------------------------- host wrapper ---------------------------------


def _pick_row_tile(H, W, max_tile_tokens):
    """Largest divisor of H whose tile (tH rows * W cols tokens) fits the token budget."""
    cap = max(1, max_tile_tokens // max(W, 1))   # if W > budget: fall back to 1-row tiles
    best = 1
    for cand in range(1, min(H, cap) + 1):
        if H % cand == 0:
            best = cand
    # TODO(synk): support non-divisor tH (prime H) via pl.cdiv grid + in-kernel tail masking.
    return best


def prepare_pallas_params(params):
    """One-time (outside the hot path): weights -> (in, out) bf16 MXU operands, biases -> f32
    (1, F) rows, conv taps -> f32.  No per-grid-step casts remain inside the kernel."""
    w1, b1, wc, bc, w2, b2 = params
    hidden = w1.shape[0]
    out_f = w2.shape[0]
    return (jnp.asarray(w1.T, jnp.bfloat16),                    # (C_in, hidden)
            jnp.asarray(b1, jnp.float32).reshape(1, hidden),
            jnp.asarray(wc, jnp.float32),                       # (3, 3, hidden)
            jnp.asarray(bc, jnp.float32).reshape(1, hidden),
            jnp.asarray(w2.T, jnp.bfloat16),                    # (hidden, out_f)
            jnp.asarray(b2, jnp.float32).reshape(1, out_f))


def mlp_forward_pallas(x, H, W, pparams, *, max_tile_tokens=1024,
                       gelu_approximate=True, vmem_limit_bytes=64 * 1024 * 1024):
    """x: (B, N, C_in) with N = H*W (row-major tokens).  Returns (B, N, out_features)."""
    B, N, C_in = x.shape
    assert N == H * W, "sequence length must equal H*W"
    assert W % 8 == 0, "W must be a multiple of 8 so in-kernel reshapes stay free"  # layout rule
    w1, b1, wc, bc, w2, b2 = pparams
    hidden = w1.shape[1]
    out_f = w2.shape[1]

    tH = _pick_row_tile(H, W, max_tile_tokens)
    nr = H // tH
    # v7x note: prefer the largest tile that still leaves >=4 grid steps per TensorCore.

    # Token-axis block indices.  Halo blocks are 1 image row (W tokens) wide, clamped at the
    # image border (the kernel zero-masks the clamped copy -> conv zero padding).
    main_map = lambda b, r: (b, r, 0)                                  # block size tH*W
    top_map = lambda b, r: (b, jnp.maximum(r * tH - 1, 0), 0)          # block size W -> row index
    bot_map = lambda b, r: (b, jnp.minimum(r * tH + tH, H - 1), 0)
    w2d_map = lambda b, r: (0, 0)
    w3d_map = lambda b, r: (0, 0, 0)

    kernel = functools.partial(_fused_mlp_kernel, tile_rows=tH, width=W,
                               gelu_approximate=gelu_approximate)

    out = pl.pallas_call(
        kernel,
        out_shape=jax.ShapeDtypeStruct((B, N, out_f), x.dtype),
        grid=(B, nr),
        in_specs=[
            pl.BlockSpec((1, W, C_in), top_map),
            pl.BlockSpec((1, tH * W, C_in), main_map),
            pl.BlockSpec((1, W, C_in), bot_map),
            pl.BlockSpec((C_in, hidden), w2d_map),
            pl.BlockSpec((1, hidden), w2d_map),
            pl.BlockSpec((3, 3, hidden), w3d_map),
            pl.BlockSpec((1, hidden), w2d_map),
            pl.BlockSpec((hidden, out_f), w2d_map),
            pl.BlockSpec((1, out_f), w2d_map),
        ],
        out_specs=pl.BlockSpec((1, tH * W, out_f), main_map),
        compiler_params=pltpu.CompilerParams(
            dimension_semantics=("parallel", "parallel"),
            vmem_limit_bytes=vmem_limit_bytes),
    )(x, x, x, w1, b1, wc, bc, w2, b2)

    return out


# -------------------------------- reference (JAX) --------------------------------


def mlp_reference(x, H, W, params):
    """f32 reference matching the PyTorch module (exact erf GELU, zero-padded depthwise conv)."""
    B, N, C_in = x.shape
    w1, b1, wc, bc, w2, b2 = params
    hidden = w1.shape[0]
    h = x.reshape(B * N, C_in) @ w1.T + b1
    h = h.reshape(B, H, W, hidden)
    conv = jax.lax.conv_general_dilated(
        h, wc.reshape(3, 3, 1, hidden),
        window_strides=(1, 1), padding=((1, 1), (1, 1)),
        dimension_numbers=("NHWC", "HWIO", "NHWC"),
        feature_group_count=hidden,
    ) + bc
    h = jax.nn.gelu(conv, approximate=False)
    h = h.reshape(B * N, hidden)
    y = h @ w2.T + b2
    return y.reshape(B, N, -1)


# ------------------------------------- main ---------------------------------------

if __name__ == "__main__":
    B, Himg, Wimg = 2, 16, 8
    N = Himg * Wimg
    in_features, hidden_features = 16, 32
    out_features = in_features

    key = jax.random.PRNGKey(0)
    kx, k1, k2, k3 = jax.random.split(key, 4)

    def trunc_normal(k, shape, std=0.02):
        return std * jax.random.truncated_normal(k, -2.0, 2.0, shape, jnp.float32)

    # Deterministic init matching the module's _init_weights:
    #   Linear: trunc_normal(std=0.02) weight (PyTorch (out, in) layout), zero bias.
    #   Depthwise Conv2d 3x3: normal(0, sqrt(2/fan_out)), fan_out = 9, zero bias.
    w1 = trunc_normal(k1, (hidden_features, in_features))
    b1 = jnp.zeros((hidden_features,), jnp.float32)
    wc = jnp.sqrt(2.0 / 9.0) * jax.random.normal(k2, (3, 3, hidden_features), jnp.float32)
    bc = jnp.zeros((hidden_features,), jnp.float32)
    w2 = trunc_normal(k3, (out_features, hidden_features))
    b2 = jnp.zeros((out_features,), jnp.float32)
    params = (w1, b1, wc, bc, w2, b2)

    x = jax.random.normal(kx, (B, N, in_features), jnp.float32)

    pparams = prepare_pallas_params(params)               # one-time, outside the hot path
    y_ref = mlp_reference(x, Himg, Wimg, params)

    # 1) production-style default: one tile per image (grid (B, 1)).
    y_big = jax.block_until_ready(mlp_forward_pallas(x, Himg, Wimg, pparams))
    # 2) small tile budget to exercise interior halos + boundary masking (grid (B, 2)).
    y_small = jax.block_until_ready(
        mlp_forward_pallas(x, Himg, Wimg, pparams, max_tile_tokens=64))

    assert y_big.shape == (B, N, out_features)
    assert y_small.shape == (B, N, out_features)
    # bf16 MXU operands + tanh GELU vs f32/erf reference -> loosened tolerance.
    assert jnp.allclose(y_big, y_ref, atol=1e-2, rtol=1e-2), "mismatch (single-tile path)"
    assert jnp.allclose(y_small, y_ref, atol=1e-2, rtol=1e-2), "mismatch (multi-tile halo path)"
    assert jnp.allclose(y_big, y_small, atol=2e-3, rtol=2e-3), "tile-size dependent result"

    print("KERNEL_OK")
</pallas_src>

<mosaic_0001>
module attributes {stable_mosaic.version = 11 : i64} {
  func.func @_fused_mlp_kernel(%arg0: i32, %arg1: i32, %arg2: memref<1x8x16xf32, #tpu.memory_space<vmem>>, %arg3: memref<1x128x16xf32, #tpu.memory_space<vmem>>, %arg4: memref<1x8x16xf32, #tpu.memory_space<vmem>>, %arg5: memref<16x32xbf16, #tpu.memory_space<vmem>>, %arg6: memref<1x32xf32, #tpu.memory_space<vmem>>, %arg7: memref<3x3x32xf32, #tpu.memory_space<vmem>>, %arg8: memref<1x32xf32, #tpu.memory_space<vmem>>, %arg9: memref<32x16xbf16, #tpu.memory_space<vmem>>, %arg10: memref<1x16xf32, #tpu.memory_space<vmem>>, %arg11: memref<1x128x16xf32, #tpu.memory_space<vmem>>) attributes {dimension_semantics = [#tpu.dimension_semantics<parallel>, #tpu.dimension_semantics<parallel>], iteration_bounds = array<i64: 2, 1>, scalar_prefetch = 0 : i64, scratch_operands = 0 : i64, tpu.core_type = #tpu.core_type<tc>, window_params = [{transform_indices = @transform_0, window_bounds = array<i64: 1, 8, 16>}, {transform_indices = @transform_1, window_bounds = array<i64: 1, 128, 16>}, {transform_indices = @transform_2, window_bounds = array<i64: 1, 8, 16>}, {pipeline_mode = #tpu.pipeline_mode<synchronous>, transform_indices = @transform_3, window_bounds = array<i64: 16, 32>}, {pipeline_mode = #tpu.pipeline_mode<synchronous>, transform_indices = @transform_4, window_bounds = array<i64: 1, 32>}, {pipeline_mode = #tpu.pipeline_mode<synchronous>, transform_indices = @transform_5, window_bounds = array<i64: 3, 3, 32>}, {pipeline_mode = #tpu.pipeline_mode<synchronous>, transform_indices = @transform_6, window_bounds = array<i64: 1, 32>}, {pipeline_mode = #tpu.pipeline_mode<synchronous>, transform_indices = @transform_7, window_bounds = array<i64: 32, 16>}, {pipeline_mode = #tpu.pipeline_mode<synchronous>, transform_indices = @transform_8, window_bounds = array<i64: 1, 16>}, {transform_indices = @transform_9, window_bounds = array<i64: 1, 128, 16>}]} {
    %c0 = arith.constant 0 : index
    %c0_0 = arith.constant 0 : index
    %c0_1 = arith.constant 0 : index
    %0 = vector.load %arg2[%c0, %c0_0, %c0_1] : memref<1x8x16xf32, #tpu.memory_space<vmem>>, vector<1x8x16xf32>
    %1 = vector.shape_cast %0 : vector<1x8x16xf32> to vector<8x16xf32>
    %c0_2 = arith.constant 0 : index
    %c0_3 = arith.constant 0 : index
    %c0_4 = arith.constant 0 : index
    %2 = vector.load %arg3[%c0_2, %c0_3, %c0_4] : memref<1x128x16xf32, #tpu.memory_space<vmem>>, vector<1x128x16xf32>
    %3 = vector.shape_cast %2 : vector<1x128x16xf32> to vector<128x16xf32>
    %c0_5 = arith.constant 0 : index
    %c0_6 = arith.constant 0 : index
    %c0_7 = arith.constant 0 : index
    %4 = vector.load %arg4[%c0_5, %c0_6, %c0_7] : memref<1x8x16xf32, #tpu.memory_space<vmem>>, vector<1x8x16xf32>
    %5 = vector.shape_cast %4 : vector<1x8x16xf32> to vector<8x16xf32>
    %6 = tpu.concatenate %1, %3, %5 in 0 : vector<8x16xf32>, vector<128x16xf32>, vector<8x16xf32> -> vector<144x16xf32>
    %7 = arith.truncf %6 : vector<144x16xf32> to vector<144x16xbf16>
    %c0_8 = arith.constant 0 : index
    %c0_9 = arith.constant 0 : index
    %8 = vector.load %arg5[%c0_8, %c0_9] : memref<16x32xbf16, #tpu.memory_space<vmem>>, vector<16x32xbf16>
    %cst = arith.constant dense<0.000000e+00> : vector<144x32xf32>
    %9 = tpu.matmul %7, %8, %cst {dimension_numbers = #tpu.dot_dimension_numbers<[1], [0], [0], [1], [0, 0, 1, 1], [], []>} : vector<144x16xbf16>, vector<16x32xbf16>, vector<144x32xf32> -> vector<144x32xf32>
    %c0_10 = arith.constant 0 : index
    %c0_11 = arith.constant 0 : index
    %10 = vector.load %arg6[%c0_10, %c0_11] : memref<1x32xf32, #tpu.memory_space<vmem>>, vector<1x32xf32>
    %11 = vector.broadcast %10 : vector<1x32xf32> to vector<144x32xf32>
    %12 = arith.addf %9, %11 : vector<144x32xf32>
    %13 = vector.shape_cast %12 : vector<144x32xf32> to vector<18x8x32xf32>
    %14 = tpu.iota {dimensions = array<i32: 0>} : vector<18x1x1xi32>
    %c0_i32 = arith.constant 0 : i32
    %15 = vector.broadcast %c0_i32 : i32 to vector<18x1x1xi32>
    %16 = arith.cmpi eq, %14, %15 : vector<18x1x1xi32>
    %c0_i32_12 = arith.constant 0 : i32
    %17 = arith.cmpi eq, %arg1, %c0_i32_12 : i32
    %18 = vector.broadcast %17 : i1 to vector<18x1x1xi1>
    %19 = arith.andi %16, %18 : vector<18x1x1xi1>
    %c17_i32 = arith.constant 17 : i32
    %20 = vector.broadcast %c17_i32 : i32 to vector<18x1x1xi32>
    %21 = arith.cmpi eq, %14, %20 : vector<18x1x1xi32>
    %c0_i32_13 = arith.constant 0 : i32
    %22 = arith.cmpi eq, %arg1, %c0_i32_13 : i32
    %23 = vector.broadcast %22 : i1 to vector<18x1x1xi1>
    %24 = arith.andi %21, %23 : vector<18x1x1xi1>
    %25 = arith.ori %19, %24 : vector<18x1x1xi1>
    %cst_14 = arith.constant 0.000000e+00 : f32
    %26 = vector.shape_cast %25 : vector<18x1x1xi1> to vector<18x1x1xi1>
    %27 = vector.broadcast %26 : vector<18x1x1xi1> to vector<18x8x32xi1>
    %28 = vector.broadcast %cst_14 : f32 to vector<18x8x32xf32>
    %29 = arith.select %27, %28, %13 : vector<18x8x32xi1>, vector<18x8x32xf32>
    %30 = tpu.iota {dimensions = array<i32: 1>} : vector<1x8x1xi32>
    %c0_i32_15 = arith.constant 0 : i32
    %31 = vector.broadcast %c0_i32_15 : i32 to vector<1x8x1xi32>
    %32 = arith.cmpi eq, %30, %31 : vector<1x8x1xi32>
    %c1_i32 = arith.constant 1 : i32
    %33 = tpu.dynamic_rotate %29 by %c1_i32 dim 1 : vector<18x8x32xf32>, i32 -> vector<18x8x32xf32>
    %cst_16 = arith.constant 0.000000e+00 : f32
    %34 = vector.shape_cast %32 : vector<1x8x1xi1> to vector<1x8x1xi1>
    %35 = vector.broadcast %34 : vector<1x8x1xi1> to vector<18x8x32xi1>
    %36 = vector.broadcast %cst_16 : f32 to vector<18x8x32xf32>
    %37 = arith.select %35, %36, %33 : vector<18x8x32xi1>, vector<18x8x32xf32>
    %c7_i32 = arith.constant 7 : i32
    %38 = vector.broadcast %c7_i32 : i32 to vector<1x8x1xi32>
    %39 = arith.cmpi eq, %30, %38 : vector<1x8x1xi32>
    %c7_i32_17 = arith.constant 7 : i32
    %40 = tpu.dynamic_rotate %29 by %c7_i32_17 dim 1 : vector<18x8x32xf32>, i32 -> vector<18x8x32xf32>
    %cst_18 = arith.constant 0.000000e+00 : f32
    %41 = vector.shape_cast %39 : vector<1x8x1xi1> to vector<1x8x1xi1>
    %42 = vector.broadcast %41 : vector<1x8x1xi1> to vector<18x8x32xi1>
    %43 = vector.broadcast %cst_18 : f32 to vector<18x8x32xf32>
    %44 = arith.select %42, %43, %40 : vector<18x8x32xi1>, vector<18x8x32xf32>
    %c0_19 = arith.constant 0 : index
    %c0_20 = arith.constant 0 : index
    %c0_21 = arith.constant 0 : index
    %45 = vector.load %arg7[%c0_19, %c0_20, %c0_21] : memref<3x3x32xf32, #tpu.memory_space<vmem>>, vector<3x3x32xf32>
    %cst_22 = arith.constant 0.000000e+00 : f32
    %46 = vector.broadcast %cst_22 : f32 to vector<16x8x32xf32>
    %47 = vector.extract_strided_slice %37 {offsets = [0, 0, 0], sizes = [16, 8, 32], strides = [1, 1, 1]} : vector<18x8x32xf32> to vector<16x8x32xf32>
    %48 = vector.extract_strided_slice %45 {offsets = [0, 0, 0], sizes = [1, 1, 32], strides = [1, 1, 1]} : vector<3x3x32xf32> to vector<1x1x32xf32>
    %49 = vector.shape_cast %48 : vector<1x1x32xf32> to vector<32xf32>
    %50 = vector.shape_cast %49 : vector<32xf32> to vector<1x1x32xf32>
    %51 = vector.broadcast %50 : vector<1x1x32xf32> to vector<16x8x32xf32>
    %52 = arith.mulf %47, %51 : vector<16x8x32xf32>
    %53 = arith.addf %46, %52 : vector<16x8x32xf32>
    %54 = vector.extract_strided_slice %29 {offsets = [0, 0, 0], sizes = [16, 8, 32], strides = [1, 1, 1]} : vector<18x8x32xf32> to vector<16x8x32xf32>
    %55 = vector.extract_strided_slice %45 {offsets = [0, 1, 0], sizes = [1, 1, 32], strides = [1, 1, 1]} : vector<3x3x32xf32> to vector<1x1x32xf32>
    %56 = vector.shape_cast %55 : vector<1x1x32xf32> to vector<32xf32>
    %57 = vector.shape_cast %56 : vector<32xf32> to vector<1x1x32xf32>
    %58 = vector.broadcast %57 : vector<1x1x32xf32> to vector<16x8x32xf32>
    %59 = arith.mulf %54, %58 : vector<16x8x32xf32>
    %60 = arith.addf %53, %59 : vector<16x8x32xf32>
    %61 = vector.extract_strided_slice %44 {offsets = [0, 0, 0], sizes = [16, 8, 32], strides = [1, 1, 1]} : vector<18x8x32xf32> to vector<16x8x32xf32>
    %62 = vector.extract_strided_slice %45 {offsets = [0, 2, 0], sizes = [1, 1, 32], strides = [1, 1, 1]} : vector<3x3x32xf32> to vector<1x1x32xf32>
    %63 = vector.shape_cast %62 : vector<1x1x32xf32> to vector<32xf32>
    %64 = vector.shape_cast %63 : vector<32xf32> to vector<1x1x32xf32>
    %65 = vector.broadcast %64 : vector<1x1x32xf32> to vector<16x8x32xf32>
    %66 = arith.mulf %61, %65 : vector<16x8x32xf32>
    %67 = arith.addf %60, %66 : vector<16x8x32xf32>
    %68 = vector.extract_strided_slice %37 {offsets = [1, 0, 0], sizes = [16, 8, 32], strides = [1, 1, 1]} : vector<18x8x32xf32> to vector<16x8x32xf32>
    %69 = vector.extract_strided_slice %45 {offsets = [1, 0, 0], sizes = [1, 1, 32], strides = [1, 1, 1]} : vector<3x3x32xf32> to vector<1x1x32xf32>
    %70 = vector.shape_cast %69 : vector<1x1x32xf32> to vector<32xf32>
    %71 = vector.shape_cast %70 : vector<32xf32> to vector<1x1x32xf32>
    %72 = vector.broadcast %71 : vector<1x1x32xf32> to vector<16x8x32xf32>
    %73 = arith.mulf %68, %72 : vector<16x8x32xf32>
    %74 = arith.addf %67, %73 : vector<16x8x32xf32>
    %75 = vector.extract_strided_slice %29 {offsets = [1, 0, 0], sizes = [16, 8, 32], strides = [1, 1, 1]} : vector<18x8x32xf32> to vector<16x8x32xf32>
    %76 = vector.extract_strided_slice %45 {offsets = [1, 1, 0], sizes = [1, 1, 32], strides = [1, 1, 1]} : vector<3x3x32xf32> to vector<1x1x32xf32>
    %77 = vector.shape_cast %76 : vector<1x1x32xf32> to vector<32xf32>
    %78 = vector.shape_cast %77 : vector<32xf32> to vector<1x1x32xf32>
    %79 = vector.broadcast %78 : vector<1x1x32xf32> to vector<16x8x32xf32>
    %80 = arith.mulf %75, %79 : vector<16x8x32xf32>
    %81 = arith.addf %74, %80 : vector<16x8x32xf32>
    %82 = vector.extract_strided_slice %44 {offsets = [1, 0, 0], sizes = [16, 8, 32], strides = [1, 1, 1]} : vector<18x8x32xf32> to vector<16x8x32xf32>
    %83 = vector.extract_strided_slice %45 {offsets = [1, 2, 0], sizes = [1, 1, 32], strides = [1, 1, 1]} : vector<3x3x32xf32> to vector<1x1x32xf32>
    %84 = vector.shape_cast %83 : vector<1x1x32xf32> to vector<32xf32>
    %85 = vector.shape_cast %84 : vector<32xf32> to vector<1x1x32xf32>
    %86 = vector.broadcast %85 : vector<1x1x32xf32> to vector<16x8x32xf32>
    %87 = arith.mulf %82, %86 : vector<16x8x32xf32>
    %88 = arith.addf %81, %87 : vector<16x8x32xf32>
    %89 = vector.extract_strided_slice %37 {offsets = [2, 0, 0], sizes = [16, 8, 32], strides = [1, 1, 1]} : vector<18x8x32xf32> to vector<16x8x32xf32>
    %90 = vector.extract_strided_slice %45 {offsets = [2, 0, 0], sizes = [1, 1, 32], strides = [1, 1, 1]} : vector<3x3x32xf32> to vector<1x1x32xf32>
    %91 = vector.shape_cast %90 : vector<1x1x32xf32> to vector<32xf32>
    %92 = vector.shape_cast %91 : vector<32xf32> to vector<1x1x32xf32>
    %93 = vector.broadcast %92 : vector<1x1x32xf32> to vector<16x8x32xf32>
    %94 = arith.mulf %89, %93 : vector<16x8x32xf32>
    %95 = arith.addf %88, %94 : vector<16x8x32xf32>
    %96 = vector.extract_strided_slice %29 {offsets = [2, 0, 0], sizes = [16, 8, 32], strides = [1, 1, 1]} : vector<18x8x32xf32> to vector<16x8x32xf32>
    %97 = vector.extract_strided_slice %45 {offsets = [2, 1, 0], sizes = [1, 1, 32], strides = [1, 1, 1]} : vector<3x3x32xf32> to vector<1x1x32xf32>
    %98 = vector.shape_cast %97 : vector<1x1x32xf32> to vector<32xf32>
    %99 = vector.shape_cast %98 : vector<32xf32> to vector<1x1x32xf32>
    %100 = vector.broadcast %99 : vector<1x1x32xf32> to vector<16x8x32xf32>
    %101 = arith.mulf %96, %100 : vector<16x8x32xf32>
    %102 = arith.addf %95, %101 : vector<16x8x32xf32>
    %103 = vector.extract_strided_slice %44 {offsets = [2, 0, 0], sizes = [16, 8, 32], strides = [1, 1, 1]} : vector<18x8x32xf32> to vector<16x8x32xf32>
    %104 = vector.extract_strided_slice %45 {offsets = [2, 2, 0], sizes = [1, 1, 32], strides = [1, 1, 1]} : vector<3x3x32xf32> to vector<1x1x32xf32>
    %105 = vector.shape_cast %104 : vector<1x1x32xf32> to vector<32xf32>
    %106 = vector.shape_cast %105 : vector<32xf32> to vector<1x1x32xf32>
    %107 = vector.broadcast %106 : vector<1x1x32xf32> to vector<16x8x32xf32>
    %108 = arith.mulf %103, %107 : vector<16x8x32xf32>
    %109 = arith.addf %102, %108 : vector<16x8x32xf32>
    %c0_23 = arith.constant 0 : index
    %c0_24 = arith.constant 0 : index
    %110 = vector.load %arg8[%c0_23, %c0_24] : memref<1x32xf32, #tpu.memory_space<vmem>>, vector<1x32xf32>
    %111 = vector.shape_cast %110 : vector<1x32xf32> to vector<1x1x32xf32>
    %112 = vector.broadcast %111 : vector<1x1x32xf32> to vector<16x8x32xf32>
    %113 = arith.addf %109, %112 : vector<16x8x32xf32>
    %114 = arith.mulf %113, %113 : vector<16x8x32xf32>
    %115 = arith.mulf %113, %114 : vector<16x8x32xf32>
    %cst_25 = arith.constant 4.471500e-02 : f32
    %116 = vector.broadcast %cst_25 : f32 to vector<16x8x32xf32>
    %117 = arith.mulf %116, %115 : vector<16x8x32xf32>
    %118 = arith.addf %113, %117 : vector<16x8x32xf32>
    %cst_26 = arith.constant 0.797884583 : f32
    %119 = vector.broadcast %cst_26 : f32 to vector<16x8x32xf32>
    %120 = arith.mulf %119, %118 : vector<16x8x32xf32>
    %121 = math.tanh %120 : vector<16x8x32xf32>
    %cst_27 = arith.constant 1.000000e+00 : f32
    %122 = vector.broadcast %cst_27 : f32 to vector<16x8x32xf32>
    %123 = arith.addf %122, %121 : vector<16x8x32xf32>
    %cst_28 = arith.constant 5.000000e-01 : f32
    %124 = vector.broadcast %cst_28 : f32 to vector<16x8x32xf32>
    %125 = arith.mulf %124, %123 : vector<16x8x32xf32>
    %126 = arith.mulf %113, %125 : vector<16x8x32xf32>
    %127 = vector.shape_cast %126 : vector<16x8x32xf32> to vector<128x32xf32>
    %128 = arith.truncf %127 : vector<128x32xf32> to vector<128x32xbf16>
    %c0_29 = arith.constant 0 : index
    %c0_30 = arith.constant 0 : index
    %129 = vector.load %arg9[%c0_29, %c0_30] : memref<32x16xbf16, #tpu.memory_space<vmem>>, vector<32x16xbf16>
    %cst_31 = arith.constant dense<0.000000e+00> : vector<128x16xf32>
    %130 = tpu.matmul %128, %129, %cst_31 {dimension_numbers = #tpu.dot_dimension_numbers<[1], [0], [0], [1], [0, 0, 1, 1], [], []>} : vector<128x32xbf16>, vector<32x16xbf16>, vector<128x16xf32> -> vector<128x16xf32>
    %c0_32 = arith.constant 0 : index
    %c0_33 = arith.constant 0 : index
    %131 = vector.load %arg10[%c0_32, %c0_33] : memref<1x16xf32, #tpu.memory_space<vmem>>, vector<1x16xf32>
    %132 = vector.broadcast %131 : vector<1x16xf32> to vector<128x16xf32>
    %133 = arith.addf %130, %132 : vector<128x16xf32>
    %c0_34 = arith.constant 0 : index
    %c0_35 = arith.constant 0 : index
    %c0_36 = arith.constant 0 : index
    %134 = vector.load %arg11[%c0_34, %c0_35, %c0_36] : memref<1x128x16xf32, #tpu.memory_space<vmem>>, vector<1x128x16xf32>
    %135 = vector.shape_cast %134 : vector<1x128x16xf32> to vector<128x16xf32>
    %136 = vector.shape_cast %133 : vector<128x16xf32> to vector<1x128x16xf32>
    tpu.vector_store %arg11[%c0_34, %c0_35, %c0_36], %136 {strides = array<i32>} : memref<1x128x16xf32, #tpu.memory_space<vmem>>, vector<1x128x16xf32>,
    return
  }
  func.func @transform_0(%arg0: i32, %arg1: i32) -> (i32, i32, i32) {
    %c16_i32 = arith.constant 16 : i32
    %0 = arith.muli %arg1, %c16_i32 : i32
    %c1_i32 = arith.constant 1 : i32
    %1 = arith.subi %0, %c1_i32 : i32
    %c0_i32 = arith.constant 0 : i32
    %2 = arith.maxsi %1, %c0_i32 : i32
    %c0_i32_0 = arith.constant 0 : i32
    %c0_i32_1 = arith.constant 0 : i32
    return %arg0, %2, %c0_i32_0 : i32, i32, i32
  }
  func.func @transform_1(%arg0: i32, %arg1: i32) -> (i32, i32, i32) {
    %c0_i32 = arith.constant 0 : i32
    %c0_i32_0 = arith.constant 0 : i32
    return %arg0, %arg1, %c0_i32 : i32, i32, i32
  }
  func.func @transform_2(%arg0: i32, %arg1: i32) -> (i32, i32, i32) {
    %c16_i32 = arith.constant 16 : i32
    %0 = arith.muli %arg1, %c16_i32 : i32
    %c16_i32_0 = arith.constant 16 : i32
    %1 = arith.addi %0, %c16_i32_0 : i32
    %c15_i32 = arith.constant 15 : i32
    %2 = arith.minsi %1, %c15_i32 : i32
    %c0_i32 = arith.constant 0 : i32
    %c0_i32_1 = arith.constant 0 : i32
    return %arg0, %2, %c0_i32 : i32, i32, i32
  }
  func.func @transform_3(%arg0: i32, %arg1: i32) -> (i32, i32) {
    %c0_i32 = arith.constant 0 : i32
    %c0_i32_0 = arith.constant 0 : i32
    %c0_i32_1 = arith.constant 0 : i32
    return %c0_i32, %c0_i32_0 : i32, i32
  }
  func.func @transform_4(%arg0: i32, %arg1: i32) -> (i32, i32) {
    %c0_i32 = arith.constant 0 : i32
    %c0_i32_0 = arith.constant 0 : i32
    %c0_i32_1 = arith.constant 0 : i32
    return %c0_i32, %c0_i32_0 : i32, i32
  }
  func.func @transform_5(%arg0: i32, %arg1: i32) -> (i32, i32, i32) {
    %c0_i32 = arith.constant 0 : i32
    %c0_i32_0 = arith.constant 0 : i32
    %c0_i32_1 = arith.constant 0 : i32
    %c0_i32_2 = arith.constant 0 : i32
    return %c0_i32, %c0_i32_0, %c0_i32_1 : i32, i32, i32
  }
  func.func @transform_6(%arg0: i32, %arg1: i32) -> (i32, i32) {
    %c0_i32 = arith.constant 0 : i32
    %c0_i32_0 = arith.constant 0 : i32
    %c0_i32_1 = arith.constant 0 : i32
    return %c0_i32, %c0_i32_0 : i32, i32
  }
  func.func @transform_7(%arg0: i32, %arg1: i32) -> (i32, i32) {
    %c0_i32 = arith.constant 0 : i32
    %c0_i32_0 = arith.constant 0 : i32
    %c0_i32_1 = arith.constant 0 : i32
    return %c0_i32, %c0_i32_0 : i32, i32
  }
  func.func @transform_8(%arg0: i32, %arg1: i32) -> (i32, i32) {
    %c0_i32 = arith.constant 0 : i32
    %c0_i32_0 = arith.constant 0 : i32
    %c0_i32_1 = arith.constant 0 : i32
    return %c0_i32, %c0_i32_0 : i32, i32
  }
  func.func @transform_9(%arg0: i32, %arg1: i32) -> (i32, i32, i32) {
    %c0_i32 = arith.constant 0 : i32
    %c0_i32_0 = arith.constant 0 : i32
    return %arg0, %arg1, %c0_i32 : i32, i32, i32
  }
}

</mosaic_0001>

<bundles_post_ra>
// kernel: tpu_custom_call.1
= control target key start
LH: loop header
LB: loop body
LE: loop exit
PB: predicated region body
PF: predicated region fallthrough
CT: control target
= control target key end

     0   :  { %s1817_s30 = smov 0   ;;  %s1819_s10 = smov 0   ;;  %s2480_s0 = inlined_call_operand.vmem [shape: f32[2,128,16], index: 0, kind: input, shape index: {}]   ;;  %s2481_s1 = inlined_call_operand.vmem [shape: f32[2,128,16], index: 1, kind: input, shape index: {}]   ;;  %s2482_s2 = inlined_call_operand.vmem [shape: f32[2,128,16], index: 2, kind: input, shape index: {}]   ;;  %s2483_s3 = inlined_call_operand.vmem [shape: bf16[16,32], index: 3, kind: input, shape index: {}]   ;;  %s2484_s4 = inlined_call_operand.vmem [shape: f32[1,32], index: 4, kind: input, shape index: {}]   ;;  %s2485_s5 = inlined_call_operand.vmem [shape: f32[3,3,32], index: 5, kind: input, shape index: {}]   ;;  %s2486_s6 = inlined_call_operand.vmem [shape: f32[1,32], index: 6, kind: input, shape index: {}]   ;;  %s2487_s7 = inlined_call_operand.vmem [shape: bf16[32,16], index: 7, kind: input, shape index: {}]   ;;  %s2488_s8 = inlined_call_operand.vmem [shape: f32[1,16], index: 8, kind: input, shape index: {}]   ;;  %s2489_s9 = inlined_call_operand.vmem [shape: f32[2,128,16], index: 9, kind: output, shape index: {}]  }
   0x1   :  { %s1821_s11 = smov 0  }
   0x2 LB: > { %s31_s12 = sadd.s32 1, %s1759_s10  ;;  %p1560_p0 = scmp.ge.s32.totalorder %s1763_s11, 1  ;;  %s1763_s11 = sphi %s1821_s11, %s19_s11   ;;  %s1759_s10 = sphi %s1819_s10, %s2491_s10   ;;  %s1755_s30 = sphi %s1817_s30, %s2490_s30  }
   0x3   : > { %p33_p1 = scmp.ge.s32.totalorder %s31_s12, 2  ;;  %p370_p2 = scmp.lt.s32.totalorder %s1763_s11, 3 }
   0x5   : > { %s2493_s12 = smov (%p33_p1, %s31_s12), 0  ;;  %p371_p3 = pnand %p1560_p0, %p370_p2 }
   0x6   : > { %p442_p4 = scmp.lt.s32.totalorder (!%p371_p3), %s1755_s30, 1 }
   0x7   : > { %374 = sbr.rel (%p371_p3) target bundleno = 561 (0x231), region = 56 }
   0xc   : > { %v1706_v0 = vld [vmem:[%s2483_s3] sm:$0xff]   ;;  %v1765_v1 = vmov 0.0   ;;  %vm1766_vm0 = vmmov 0   ;;  %s2495_s30 = smov (!%p442_p4, %s1755_s30), 1  ;;  %vm533_vm1 = vcmask 130048   ;;  %v1707_v29 = vld [vmem:[%s2487_s7 + $0x8] sm:$0xff]   ;;  %v690_v30 = vlaneseq }
   0xd   : > { %1620 = vmatprep.subr.bf16.mxu0 %v1765_v1  ;;  %1678 = vmatprep.subr.bf16.mxu1 %v1765_v1  ;;  %s1844_s15 = sshll.u32 %s2495_s30, 7  ;;  %v693_v34 = vrot.slane %v1765_v1, 7  ;;  %v770_v35 = vld [vmem:[%s2485_s5] sm:$0x7]  ;;  %v732_v40 = vrot.slane %v1765_v1, 1  ;;  %vm1295_vm4 = vcmask 261120  }
   0xe   : > { %1621 = vmatpush3.bf16.msra.mxu0 %v1706_v0  ;;  %1622 = vmatprep.mubr.msk.bf16.mxu0 %vm1766_vm0, %v1765_v1  ;;  %s449_s18 = scalar_lea.vmem %s2480_s0, %s1844_s15  ;;  %s1854_s21 = scalar_lea.vmem %s2481_s1, %s1844_s15  ;;  %v1902_v31 = vshrl.u32 %v690_v30, 7  ;;  %v1708_v44 = vld [vmem:[%s2487_s7] sm:$0xff]   ;;  %v772_v48 = vld [vmem:[%s2485_s5 + $0x8] sm:$0x7] }
   0xf   : > { %1679 = vmatpush3.bf16.msra.mxu1 %v1706_v0  ;;  %1650 = vmatprep.mubr.msk.bf16.mxu1 %vm1766_vm0, %v1765_v1  ;;  %v491_v2 = vld [vmem:[%s449_s18] sm:$0xff]  ;;  %s1597_s22 = sadd.s32 120, %s1844_s15  ;;  %v505_v5 = vld [vmem:[%s1854_s21 + $0x68] sm:$0xff]  ;;  %v506_v6 = vld [vmem:[%s1854_s21 + $0x70] sm:$0xff]  ;;  %s2437_s27 = scalar_lea.vmem %s2489_s9, %s1844_s15 }
  0x10   : > { %v492_v3 = vld [vmem:[%s1854_s21] sm:$0xff]  ;;  %v516_v7 = vpack.c.bf16 %v506_v6, %v505_v5  ;;  %s475_s25 = scalar_lea.vmem %s2482_s2, %s1597_s22  ;;  %v493_v8 = vld [vmem:[%s1854_s21 + $0x8] sm:$0xff]  ;;  %v494_v9 = vld [vmem:[%s1854_s21 + $0x10] sm:$0xff]  ;;  %1658 = vmatprep.subr.bf16.mxu1 %v1707_v29  ;;  %v775_v32 = vsub.s32 0, %v1902_v31  ;;  %v811_v33 = vsub.s32 1, %v1902_v31  ;;  %vm692_vm2 = vcmp.eq.s32.totalorder %v1902_v31, 0 }
  0x11   : > { %v509_v4 = vpack.c.bf16 %v492_v3, %v491_v2  ;;  %v507_v10 = vld [vmem:[%s1854_s21 + $0x78] sm:$0xff]  ;;  %v508_v11 = vld [vmem:[%s475_s25] sm:$0xff]  ;;  %v510_v12 = vpack.c.bf16 %v494_v9, %v493_v8  ;;  %v497_v17 = vld [vmem:[%s1854_s21 + $0x28] sm:$0xff]  ;;  %v847_v38 = vsub.s32 2, %v1902_v31  ;;  %v713_v39 = vsel %vm692_vm2, 0.0, %v693_v34 }
  0x12   : > { %1651 = vmatmul.mubr.msk.bf16.vlgmr.msra.gmra.mxu1 %vm533_vm1, %v516_v7  ;;  %v517_v13 = vpack.c.bf16 %v508_v11, %v507_v10  ;;  %v495_v14 = vld [vmem:[%s1854_s21 + $0x18] sm:$0xff]  ;;  %v496_v15 = vld [vmem:[%s1854_s21 + $0x20] sm:$0xff]  ;;  %v498_v18 = vld [vmem:[%s1854_s21 + $0x30] sm:$0xff]  ;;  %v1911_v36 = vrot.slane %v770_v35, %v775_v32  ;;  %v1913_v37 = vrot.slane %v770_v35, %v811_v33  ;;  %vm731_vm3 = vcmp.eq.s32.totalorder %v1902_v31, 7 }
  0x13   : > { %1623 = vmatmul.mubr.msk.bf16.vlgmr.msra.gmra.mxu0 %vm533_vm1, %v509_v4  ;;  %1654 = vmatprep.mubr.msk.bf16.mxu1 %vm1766_vm0, %v1765_v1  ;;  %v511_v16 = vpack.c.bf16 %v496_v15, %v495_v14  ;;  %v512_v19 = vpack.c.bf16 %v498_v18, %v497_v17  ;;  %v499_v20 = vld [vmem:[%s1854_s21 + $0x38] sm:$0xff]  ;;  %v500_v21 = vld [vmem:[%s1854_s21 + $0x40] sm:$0xff]  ;;  %v501_v23 = vld [vmem:[%s1854_s21 + $0x48] sm:$0xff]  ;;  %v1922_v43 = vrot.slane %v770_v35, %v847_v38  ;;  %v752_v45 = vsel %vm731_vm3, 0.0, %v732_v40 }
  0x14   : > { %1626 = vmatprep.mubr.msk.bf16.mxu0 %vm1766_vm0, %v1765_v1  ;;  %v513_v22 = vpack.c.bf16 %v500_v21, %v499_v20  ;;  %v502_v24 = vld [vmem:[%s1854_s21 + $0x50] sm:$0xff]  ;;  %v503_v26 = vld [vmem:[%s1854_s21 + $0x58] sm:$0xff]  ;;  %v504_v27 = vld [vmem:[%s1854_s21 + $0x60] sm:$0xff]  ;;  %1659 = vmatpush3.bf16.msra.mxu1 %v1707_v29  ;;  %v777_v41 = vmul.f32 %v1911_v36, %v713_v39  ;;  %v813_v42 = vmul.f32 0.0, %v1913_v37  ;;  %v1943_v55 = vrot.slane %v772_v48, %v847_v38 }
  0x15   : > { %v514_v25 = vpack.c.bf16 %v502_v24, %v501_v23  ;;  %v515_v28 = vpack.c.bf16 %v504_v27, %v503_v26  ;;  %1660 = vmatprep.subr.bf16.mxu1 %v1708_v44  ;;  %v771_v46 = vld [vmem:[%s2485_s5 + $0x4] sm:$0x7]  ;;  %v849_v50 = vmul.f32 %v1922_v43, %v752_v45  ;;  %v1939_v51 = vld [vmem:[%s2484_s4] ss:$0 sm:$0xff]  ;;  %v1950_v59 = vrot.slane %v772_v48, %v775_v32 }
  0x16   : > { %v829_v49 = vadd.f32 %v813_v42, %v777_v41  ;;  %v1941_v54 = vrot.slane %v771_v46, %v811_v33  ;;  %v1946_v57 = vrot.slane %v771_v46, %v775_v32  ;;  %v1948_v58 = vrot.slane %v771_v46, %v847_v38 }
  0x17   : > { %v1952_v60 = vrot.slane %v772_v48, %v811_v33  ;;  %v1955_v0 = vmul.f32 %v1943_v55, %v752_v45  ;;  %v1960_v6 = vmul.f32 %v1950_v59, %v713_v39 }
  0x18   : > { %1661 = vmatpush3.bf16.msra.mxu1 %v1708_v44  ;;  %v865_v63 = vadd.f32 %v849_v50, %v829_v49 }
  0x19   : > { %v1963_v7 = vmul.f32 0.0, %v1952_v60 }
  0x1a   : > { %1655 = vmatmul.mubr.msk.bf16.gmra.mxu1 %vm533_vm1, %v517_v13 }
  0x1b   : > { %1627 = vmatmul.mubr.msk.bf16.gmra.mxu0 %vm533_vm1, %v510_v12 }
  0x1c   : > { %1630 = vmatprep.mubr.msk.bf16.mxu0 %vm1766_vm0, %v1765_v1 }
  0x23   : > { %1631 = vmatmul.mubr.msk.bf16.gmra.mxu0 %vm533_vm1, %v511_v16 }
  0x24   : > { %1634 = vmatprep.mubr.msk.bf16.mxu0 %vm1766_vm0, %v1765_v1 }
  0x2b   : > { %1635 = vmatmul.mubr.msk.bf16.gmra.mxu0 %vm533_vm1, %v512_v19 }
  0x2c   : > { %1638 = vmatprep.mubr.msk.bf16.mxu0 %vm1766_vm0, %v1765_v1 }
  0x33   : > { %1639 = vmatmul.mubr.msk.bf16.gmra.mxu0 %vm533_vm1, %v513_v22 }
  0x34   : > { %1642 = vmatprep.mubr.msk.bf16.mxu0 %vm1766_vm0, %v1765_v1 }
  0x3b   : > { %1643 = vmatmul.mubr.msk.bf16.gmra.mxu0 %vm533_vm1, %v514_v25 }
  0x3c   : > { %1646 = vmatprep.mubr.msk.bf16.mxu0 %vm1766_vm0, %v1765_v1 }
  0x43   : > { %1647 = vmatmul.mubr.msk.bf16.gmra.mxu0 %vm533_vm1, %v515_v28 }
  0xd2   : > { %v651_v52 = vpop.f32.mrf.mxu1 }
  0xd3   : > { %v595_v47 = vpop.f32.mrf.mxu0  ;;  %v652_v56 = vadd.f32 %v1939_v51, %v651_v52 }
  0xd4   : > { %v1652_v61 = vpop.f32.mrf.mxu1 }
  0xd5   : > { %v1624_v53 = vpop.f32.mrf.mxu0  ;;  %v707_v1 = vrot.slane %v652_v56, 7  ;;  %v746_v2 = vrot.slane %v652_v56, 1  ;;  %v827_v4 = vmul.f32 %v1913_v37, %v652_v56  ;;  %v1970_v11 = vmul.f32 %v1941_v54, %v652_v56 }
  0xd6   : > { %v654_v5 = vpop.f32.mrf.mxu1  ;;  %v1973_v12 = vmul.f32 %v1952_v60, %v652_v56 }
  0xd7   : > { %v598_v62 = vpop.f32.mrf.mxu0  ;;  %v727_v9 = vsel %vm692_vm2, 0.0, %v707_v1  ;;  %v766_v10 = vsel %vm731_vm3, 0.0, %v746_v2  ;;  %v1977_v16 = vadd.f32 %v1939_v51, %v654_v5 }
  0xd8   : > { %v599_v3 = vadd.f32 %v1939_v51, %v598_v62  ;;  %v1653_v17 = vpop.f32.mrf.mxu1  ;;  %v791_v20 = vmul.f32 %v1911_v36, %v727_v9  ;;  %v863_v21 = vmul.f32 %v1922_v43, %v766_v10  ;;  %v1983_v22 = vmul.f32 %v1946_v57, %v727_v9 }
  0xd9   : > { %v1625_v8 = vpop.f32.mrf.mxu0  ;;  %v1991_v26 = vmul.f32 %v1948_v58, %v766_v10  ;;  %v1999_v32 = vmul.f32 %v1950_v59, %v727_v9  ;;  %v2012_v62 = vmul.f32 %v1943_v55, %v766_v10 }
  0xda   : > { %v694_v13 = vrot.slane %v599_v3, 7  ;;  %v733_v14 = vrot.slane %v599_v3, 1  ;;  %v814_v15 = vmul.f32 %v1913_v37, %v599_v3  ;;  %v921_v18 = vmul.f32 %v1941_v54, %v599_v3  ;;  %v1993_v27 = vpop.f32.mrf.mxu1 }
  0xdb   : > { %v603_v19 = vpop.f32.mrf.mxu0  ;;  %v843_v49 = vadd.f32 %v827_v4, %v791_v20 }
  0xdc   : > { %v714_v23 = vsel %vm692_vm2, 0.0, %v694_v13  ;;  %v753_v24 = vsel %vm731_vm3, 0.0, %v733_v14  ;;  %v604_v25 = vadd.f32 %v1939_v51, %v603_v19  ;;  %v1656_v40 = vpop.f32.mrf.mxu1 }
  0xdd   : > { %v778_v28 = vmul.f32 %v1911_v36, %v714_v23  ;;  %v850_v29 = vmul.f32 %v1922_v43, %v753_v24  ;;  %v885_v30 = vmul.f32 %v1946_v57, %v714_v23  ;;  %v1628_v33 = vpop.f32.mrf.mxu0  ;;  %v957_v34 = vmul.f32 %v1948_v58, %v753_v24 }
  0xde   : > { %v695_v35 = vrot.slane %v604_v25, 7  ;;  %v734_v38 = vrot.slane %v604_v25, 1  ;;  %v815_v39 = vmul.f32 %v1913_v37, %v604_v25  ;;  %v922_v44 = vmul.f32 %v1941_v54, %v604_v25  ;;  %v662_v52 = vpop.f32.mrf.mxu1 }
  0xdf   : > { %v830_v41 = vadd.f32 %v814_v15, %v778_v28  ;;  %v901_v42 = vadd.f32 %v885_v30, %v865_v63  ;;  %v1029_v45 = vmul.f32 %v1952_v60, %v604_v25  ;;  %v606_v46 = vpop.f32.mrf.mxu0 }
  0xe0   : > { %v715_v47 = vsel %vm692_vm2, 0.0, %v695_v35  ;;  %v754_v48 = vsel %vm731_vm3, 0.0, %v734_v38  ;;  %v607_v50 = vadd.f32 %v1939_v51, %v606_v46  ;;  %v1657_v4 = vpop.f32.mrf.mxu1 }
  0xe1   : > { %v866_v53 = vadd.f32 %v850_v29, %v830_v41  ;;  %v937_v56 = vadd.f32 %v921_v18, %v901_v42  ;;  %v779_v61 = vmul.f32 %v1911_v36, %v715_v47  ;;  %v1629_v63 = vpop.f32.mrf.mxu0  ;;  %v851_v1 = vmul.f32 %v1922_v43, %v754_v48 }
  0xe2   : > { %v886_v2 = vmul.f32 %v1946_v57, %v715_v47  ;;  %v958_v3 = vmul.f32 %v1948_v58, %v754_v48  ;;  %v993_v5 = vmul.f32 %v1950_v59, %v715_v47  ;;  %v1065_v13 = vmul.f32 %v1943_v55, %v754_v48 }
  0xe3   : > { %v973_v8 = vadd.f32 %v957_v34, %v937_v56  ;;  %v831_v9 = vadd.f32 %v815_v39, %v779_v61  ;;  %v696_v14 = vrot.slane %v607_v50, 7  ;;  %v611_v15 = vpop.f32.mrf.mxu0  ;;  %v879_v18 = vadd.f32 %v863_v21, %v843_v49 }
  0xe4   : > { %v902_v17 = vadd.f32 %v886_v2, %v866_v53  ;;  %v735_v10 = vrot.slane %v607_v50, 1  ;;  %v816_v19 = vmul.f32 %v1913_v37, %v607_v50  ;;  %v923_v25 = vmul.f32 %v1941_v54, %v607_v50 }
  0xe5   : > { %v867_v20 = vadd.f32 %v851_v1, %v831_v9  ;;  %v1009_v23 = vadd.f32 %v993_v5, %v973_v8  ;;  %v716_v24 = vsel %vm692_vm2, 0.0, %v696_v14  ;;  %v1632_v28 = vpop.f32.mrf.mxu0  ;;  %v1030_v39 = vmul.f32 %v1952_v60, %v607_v50 }
  0xe6   : > { %v938_v29 = vadd.f32 %v922_v44, %v902_v17  ;;  %v755_v30 = vsel %vm731_vm3, 0.0, %v735_v10  ;;  %v780_v33 = vmul.f32 %v1911_v36, %v716_v24  ;;  %v887_v34 = vmul.f32 %v1946_v57, %v716_v24 }
  0xe7   : > { %v1045_v21 = vadd.f32 %v1029_v45, %v1009_v23  ;;  %v852_v35 = vmul.f32 %v1922_v43, %v755_v30  ;;  %v959_v38 = vmul.f32 %v1948_v58, %v755_v30  ;;  %v2030_v40 = vpop.f32.mrf.mxu0  ;;  %v994_v44 = vmul.f32 %v1950_v59, %v716_v24 }
  0xe8   : > { %v974_v41 = vadd.f32 %v958_v3, %v938_v29  ;;  %v832_v42 = vadd.f32 %v816_v19, %v780_v33  ;;  %v903_v46 = vadd.f32 %v887_v34, %v867_v20  ;;  %v1066_v48 = vmul.f32 %v1943_v55, %v755_v30 }
  0xe9   : > { %v2033_v47 = vadd.f32 %v1065_v13, %v1045_v21  ;;  %v708_v49 = vrot.slane %v1977_v16, 7  ;;  %v747_v45 = vrot.slane %v1977_v16, 1  ;;  %v1633_v52 = vpop.f32.mrf.mxu0  ;;  %v828_v50 = vmul.f32 %v1913_v37, %v1977_v16 }
  0xea   : > { %v868_v53 = vadd.f32 %v852_v35, %v832_v42  ;;  %v939_v56 = vadd.f32 %v923_v25, %v903_v46  ;;  %v1010_v61 = vadd.f32 %v994_v44, %v974_v41  ;;  %v935_v2 = vmul.f32 %v1941_v54, %v1977_v16 }
  0xeb   : > { %v728_v63 = vsel %vm692_vm2, 0.0, %v708_v49  ;;  %v767_v1 = vsel %vm731_vm3, 0.0, %v747_v45  ;;  %v612_v3 = vadd.f32 %v1939_v51, %v611_v15  ;;  %v619_v5 = vpop.f32.mrf.mxu0  ;;  %v2051_v13 = vmul.f32 %v1952_v60, %v1977_v16 }
  0xec   : > { %v1046_v4 = vadd.f32 %v1030_v39, %v1010_v61  ;;  %v792_v8 = vmul.f32 %v1911_v36, %v728_v63  ;;  %v899_v9 = vmul.f32 %v1946_v57, %v728_v63  ;;  %v975_v14 = vadd.f32 %v959_v38, %v939_v56 }
  0xed   : > { %v2054_v17 = vmul.f32 %v1950_v59, %v728_v63  ;;  %v697_v10 = vrot.slane %v612_v3, 7  ;;  %v736_v19 = vrot.slane %v612_v3, 1  ;;  %v1636_v20 = vpop.f32.mrf.mxu0  ;;  %v2059_v25 = vmul.f32 %v1943_v55, %v767_v1 }
  0xee   : > { %v2056_v23 = vadd.f32 %v1066_v48, %v1046_v4  ;;  %v844_v15 = vadd.f32 %v828_v50, %v792_v8  ;;  %v915_v24 = vadd.f32 %v899_v9, %v879_v18  ;;  %v817_v29 = vmul.f32 %v1913_v37, %v612_v3 }
  0xef   : > { %v717_v28 = vsel %vm692_vm2, 0.0, %v697_v10  ;;  %v756_v16 = vsel %vm731_vm3, 0.0, %v736_v19  ;;  %v924_v30 = vmul.f32 %v1941_v54, %v612_v3  ;;  %v622_v33 = vpop.f32.mrf.mxu0  ;;  %v1031_v18 = vmul.f32 %v1952_v60, %v612_v3 }
  0xf0   : > { %v951_v34 = vadd.f32 %v935_v2, %v915_v24  ;;  %v781_v21 = vmul.f32 %v1911_v36, %v717_v28  ;;  %v888_v35 = vmul.f32 %v1946_v57, %v717_v28  ;;  %v853_v38 = vmul.f32 %v1922_v43, %v756_v16 }
  0xf1   : > { %v960_v39 = vmul.f32 %v1948_v58, %v756_v16  ;;  %v995_v41 = vmul.f32 %v1950_v59, %v717_v28  ;;  %v660_v42 = vadd.f32 %v1939_v51, %v1993_v27  ;;  %v1637_v46 = vpop.f32.mrf.mxu0  ;;  %v864_v49 = vmul.f32 %v1922_v43, %v767_v1 }
  0xf2   : > { %v833_v44 = vadd.f32 %v817_v29, %v781_v21  ;;  %v904_v48 = vadd.f32 %v888_v35, %v868_v53  ;;  %v971_v45 = vmul.f32 %v1948_v58, %v767_v1  ;;  %v1067_v56 = vmul.f32 %v1943_v55, %v756_v16 }
  0xf3   : > { %v1011_v52 = vadd.f32 %v995_v41, %v975_v14  ;;  %v709_v61 = vrot.slane %v660_v42, 7  ;;  %v748_v50 = vrot.slane %v660_v42, 1  ;;  %v627_v63 = vpop.f32.mrf.mxu0  ;;  %v880_v3 = vadd.f32 %v864_v49, %v844_v15 }
  0xf4   : > { %v940_v2 = vadd.f32 %v924_v30, %v904_v48  ;;  %v936_v4 = vmul.f32 %v1941_v54, %v660_v42  ;;  %v987_v8 = vadd.f32 %v971_v45, %v951_v34  ;;  %v869_v9 = vadd.f32 %v853_v38, %v833_v44  ;;  %v2095_v34 = vld [vmem:[%s2486_s6] ss:$0 sm:$0xff] }
  0xf5   : > { %v1047_v27 = vadd.f32 %v1031_v18, %v1011_v52  ;;  %v729_v53 = vsel %vm692_vm2, 0.0, %v709_v61  ;;  %v768_v10 = vsel %vm731_vm3, 0.0, %v748_v50  ;;  %v1640_v1 = vpop.f32.mrf.mxu0  ;;  %v1043_v24 = vmul.f32 %v1952_v60, %v660_v42 }
  0xf6   : > { %v976_v14 = vadd.f32 %v960_v39, %v940_v2  ;;  %v900_v19 = vmul.f32 %v1946_v57, %v729_v53  ;;  %v1007_v20 = vmul.f32 %v1950_v59, %v729_v53  ;;  %v972_v28 = vmul.f32 %v1948_v58, %v768_v10 }
  0xf7   : > { %v1083_v15 = vadd.f32 %v1067_v56, %v1047_v27  ;;  %v615_v16 = vadd.f32 %v1939_v51, %v2030_v40  ;;  %v620_v29 = vadd.f32 %v1939_v51, %v619_v5  ;;  %v2090_v30 = vpop.f32.mrf.mxu0  ;;  %v1079_v18 = vmul.f32 %v1943_v55, %v768_v10 }
  0xf8   : > { %v916_v21 = vadd.f32 %v900_v19, %v880_v3  ;;  %v1023_v35 = vadd.f32 %v1007_v20, %v987_v8  ;;  %v2099_v38 = vadd.f32 %v1939_v51, %v622_v33  ;;  %v2105_v5 = vadd.f32 %v1939_v51, %v627_v63 }
  0xf9   : > { %v2102_v39 = vadd.f32 %v2095_v34, %v1083_v15  ;;  %v698_v40 = vrot.slane %v615_v16, 7  ;;  %v737_v41 = vrot.slane %v615_v16, 1  ;;  %v1641_v42 = vpop.f32.mrf.mxu0  ;;  %v818_v48 = vmul.f32 %v1913_v37, %v615_v16 }
  0xfa   : > { %v952_v46 = vadd.f32 %v936_v4, %v916_v21  ;;  %v1059_v44 = vadd.f32 %v1043_v24, %v1023_v35  ;;  %v925_v49 = vmul.f32 %v1941_v54, %v615_v16  ;;  %v699_v56 = vrot.slane %v620_v29, 7 }
  0xfb   : > { %v1122_v45 = vmul.f32 %v2102_v39, %v2102_v39  ;;  %v718_v33 = vsel %vm692_vm2, 0.0, %v698_v40  ;;  %v757_v52 = vsel %vm731_vm3, 0.0, %v737_v41  ;;  %v2115_v61 = vpop.f32.mrf.mxu0  ;;  %v1032_v3 = vmul.f32 %v1952_v60, %v615_v16 }
  0xfc   : > { %v988_v50 = vadd.f32 %v972_v28, %v952_v46  ;;  %v1095_v63 = vadd.f32 %v1079_v18, %v1059_v44  ;;  %v782_v2 = vmul.f32 %v1911_v36, %v718_v33  ;;  %v854_v8 = vmul.f32 %v1922_v43, %v757_v52 }
  0xfd   : > { %v1138_v4 = vmul.f32 %v1122_v45, %v2102_v39  ;;  %v889_v27 = vmul.f32 %v1946_v57, %v718_v33  ;;  %v996_v53 = vmul.f32 %v1950_v59, %v718_v33  ;;  %v1644_v10 = vpop.f32.mrf.mxu0  ;;  %v961_v24 = vmul.f32 %v1948_v58, %v757_v52 }
  0xfe   : > { %v1024_v1 = vadd.f32 %v1960_v6, %v988_v50  ;;  %v2125_v19 = vadd.f32 %v2095_v34, %v1095_v63  ;;  %v834_v20 = vadd.f32 %v818_v48, %v782_v2  ;;  %v1068_v16 = vmul.f32 %v1943_v55, %v757_v52 }
  0xff   : > { %v905_v15 = vadd.f32 %v889_v27, %v869_v9  ;;  %v1012_v28 = vadd.f32 %v996_v53, %v976_v14  ;;  %v719_v21 = vsel %vm692_vm2, 0.0, %v699_v56  ;;  %v2131_v35 = vpop.f32.mrf.mxu0  ;;  %v2133_v18 = vmul.f32 0.044715, %v1138_v4 }
 0x100   : > { %v870_v40 = vadd.f32 %v854_v8, %v834_v20  ;;  %v738_v41 = vrot.slane %v620_v29, 1  ;;  %v783_v6 = vmul.f32 %v1911_v36, %v719_v21  ;;  %v819_v44 = vmul.f32 %v1913_v37, %v620_v29 }
 0x101   : > { %v941_v42 = vadd.f32 %v925_v49, %v905_v15  ;;  %v1048_v46 = vadd.f32 %v1032_v3, %v1012_v28  ;;  %v890_v9 = vmul.f32 %v1946_v57, %v719_v21  ;;  %v1645_v14 = vpop.f32.mrf.mxu0  ;;  %v2139_v48 = vadd.f32 %v1963_v7, %v1024_v1 }
 0x102   : > { %v758_v45 = vsel %vm731_vm3, 0.0, %v738_v41  ;;  %v926_v33 = vmul.f32 %v1941_v54, %v620_v29  ;;  %v997_v52 = vmul.f32 %v1950_v59, %v719_v21  ;;  %v835_v63 = vadd.f32 %v819_v44, %v783_v6 }
 0x103   : > { %v977_v56 = vadd.f32 %v961_v24, %v941_v42  ;;  %v1084_v50 = vadd.f32 %v1068_v16, %v1048_v46  ;;  %v855_v49 = vmul.f32 %v1922_v43, %v758_v45  ;;  %v2146_v2 = vpop.f32.mrf.mxu0  ;;  %v906_v3 = vadd.f32 %v890_v9, %v870_v40 }
 0x104   : > { %v962_v4 = vmul.f32 %v1948_v58, %v758_v45  ;;  %v1033_v7 = vmul.f32 %v1952_v60, %v620_v29  ;;  %v1069_v8 = vmul.f32 %v1943_v55, %v758_v45  ;;  %v700_v1 = vrot.slane %v2099_v38, 7 }
 0x105   : > { %v2152_v27 = vadd.f32 %v2095_v34, %v1084_v50  ;;  %v871_v53 = vadd.f32 %v855_v49, %v835_v63  ;;  %v1013_v10 = vadd.f32 %v997_v52, %v977_v56  ;;  %v1648_v20 = vpop.f32.mrf.mxu0  ;;  %v942_v24 = vadd.f32 %v926_v33, %v906_v3 }
 0x106   : > { %v739_v15 = vrot.slane %v2099_v38, 1  ;;  %v820_v28 = vmul.f32 %v1913_v37, %v2099_v38  ;;  %v927_v16 = vmul.f32 %v1941_v54, %v2099_v38  ;;  %v720_v40 = vsel %vm692_vm2, 0.0, %v700_v1 }
 0x107   : > { %v1123_v29 = vmul.f32 %v2152_v27, %v2152_v27  ;;  %v1049_v21 = vadd.f32 %v1033_v7, %v1013_v10  ;;  %v1034_v41 = vmul.f32 %v1952_v60, %v2099_v38  ;;  %v646_v6 = vpop.f32.mrf.mxu0  ;;  %v978_v42 = vadd.f32 %v962_v4, %v942_v24 }
 0x108   : > { %v759_v46 = vsel %vm731_vm3, 0.0, %v739_v15  ;;  %v784_v44 = vmul.f32 %v1911_v36, %v720_v40  ;;  %v891_v9 = vmul.f32 %v1946_v57, %v720_v40  ;;  %v998_v63 = vmul.f32 %v1950_v59, %v720_v40 }
 0x109   : > { %v1139_v14 = vmul.f32 %v1123_v29, %v2152_v27  ;;  %v2171_v45 = vadd.f32 %v1069_v8, %v1049_v21  ;;  %v856_v33 = vmul.f32 %v1922_v43, %v759_v46  ;;  %v963_v52 = vmul.f32 %v1948_v58, %v759_v46  ;;  %v1649_v56 = vpop.f32.mrf.mxu0 }
 0x10a   : > { %v836_v50 = vadd.f32 %v820_v28, %v784_v44  ;;  %v907_v38 = vadd.f32 %v891_v9, %v871_v53  ;;  %v1070_v49 = vmul.f32 %v1943_v55, %v759_v46  ;;  %v701_v4 = vrot.slane %v2105_v5, 7 }
 0x10b   : > { %v2177_v3 = vmul.f32 0.044715, %v1139_v14  ;;  %v740_v7 = vrot.slane %v2105_v5, 1  ;;  %v821_v8 = vmul.f32 %v1913_v37, %v2105_v5  ;;  %v1014_v20 = vadd.f32 %v998_v63, %v978_v42 }
 0x10c   : > { %v872_v10 = vadd.f32 %v856_v33, %v836_v50  ;;  %v943_v1 = vadd.f32 %v927_v16, %v907_v38  ;;  %v928_v24 = vmul.f32 %v1941_v54, %v2105_v5  ;;  %v721_v53 = vsel %vm692_vm2, 0.0, %v701_v4 }
 0x10d   : > { %v760_v15 = vsel %vm731_vm3, 0.0, %v740_v7  ;;  %v1035_v28 = vmul.f32 %v1952_v60, %v2105_v5  ;;  %v631_v29 = vadd.f32 %v1939_v51, %v2090_v30  ;;  %v1050_v40 = vadd.f32 %v1034_v41, %v1014_v20 }
 0x10e   : > { %v979_v21 = vadd.f32 %v963_v52, %v943_v1  ;;  %v785_v16 = vmul.f32 %v1911_v36, %v721_v53  ;;  %v857_v42 = vmul.f32 %v1922_v43, %v760_v15  ;;  %v892_v46 = vmul.f32 %v1946_v57, %v721_v53 }
 0x10f   : > { %v964_v44 = vmul.f32 %v1948_v58, %v760_v15  ;;  %v999_v9 = vmul.f32 %v1950_v59, %v721_v53  ;;  %v1071_v14 = vmul.f32 %v1943_v55, %v760_v15  ;;  %v2199_v33 = vadd.f32 %v1070_v49, %v1050_v40 }
 0x110   : > { %v837_v5 = vadd.f32 %v821_v8, %v785_v16  ;;  %v702_v56 = vrot.slane %v631_v29, 7  ;;  %v741_v50 = vrot.slane %v631_v29, 1  ;;  %v908_v30 = vadd.f32 %v892_v46, %v872_v10 }
 0x111   : > { %v1015_v52 = vadd.f32 %v999_v9, %v979_v21  ;;  %v822_v41 = vmul.f32 %v1913_v37, %v631_v29  ;;  %v929_v38 = vmul.f32 %v1941_v54, %v631_v29  ;;  %v1036_v1 = vmul.f32 %v1952_v60, %v631_v29 }
 0x112   : > { %v873_v63 = vadd.f32 %v857_v42, %v837_v5  ;;  %v722_v4 = vsel %vm692_vm2, 0.0, %v702_v56  ;;  %v761_v7 = vsel %vm731_vm3, 0.0, %v741_v50  ;;  %v944_v49 = vadd.f32 %v928_v24, %v908_v30 }
 0x113   : > { %v1051_v20 = vadd.f32 %v1035_v28, %v1015_v52  ;;  %v786_v8 = vmul.f32 %v1911_v36, %v722_v4  ;;  %v858_v10 = vmul.f32 %v1922_v43, %v761_v7  ;;  %v893_v53 = vmul.f32 %v1946_v57, %v722_v4 }
 0x114   : > { %v965_v15 = vmul.f32 %v1948_v58, %v761_v7  ;;  %v1000_v21 = vmul.f32 %v1950_v59, %v722_v4  ;;  %v1072_v40 = vmul.f32 %v1943_v55, %v761_v7  ;;  %v980_v16 = vadd.f32 %v964_v44, %v944_v49 }
 0x115   : > { %v2214_v42 = vadd.f32 %v1071_v14, %v1051_v20  ;;  %v838_v46 = vadd.f32 %v822_v41, %v786_v8  ;;  %v636_v24 = vadd.f32 %v1939_v51, %v2115_v61  ;;  %v909_v28 = vadd.f32 %v893_v53, %v873_v63 }
 0x116   : > { %v639_v29 = vadd.f32 %v1939_v51, %v2131_v35  ;;  %v644_v9 = vadd.f32 %v1939_v51, %v2146_v2  ;;  %v2223_v5 = vadd.f32 %v1939_v51, %v646_v6  ;;  %v1016_v50 = vadd.f32 %v1000_v21, %v980_v16 }
 0x117   : > { %v874_v56 = vadd.f32 %v858_v10, %v838_v46  ;;  %v703_v30 = vrot.slane %v636_v24, 7  ;;  %v742_v44 = vrot.slane %v636_v24, 1  ;;  %v945_v14 = vadd.f32 %v929_v38, %v909_v28 }
 0x118   : > { %v823_v52 = vmul.f32 %v1913_v37, %v636_v24  ;;  %v930_v41 = vmul.f32 %v1941_v54, %v636_v24  ;;  %v1037_v61 = vmul.f32 %v1952_v60, %v636_v24  ;;  %v1052_v63 = vadd.f32 %v1036_v1, %v1016_v50 }
 0x119   : > { %v723_v35 = vsel %vm692_vm2, 0.0, %v703_v30  ;;  %v762_v2 = vsel %vm731_vm3, 0.0, %v742_v44  ;;  %v704_v51 = vrot.slane %v639_v29, 7  ;;  %v981_v6 = vadd.f32 %v965_v15, %v945_v14 }
 0x11a   : > { %v787_v4 = vmul.f32 %v1911_v36, %v723_v35  ;;  %v859_v7 = vmul.f32 %v1922_v43, %v762_v2  ;;  %v894_v38 = vmul.f32 %v1946_v57, %v723_v35  ;;  %v2235_v49 = vadd.f32 %v1072_v40, %v1052_v63 }
 0x11b   : > { %v966_v20 = vmul.f32 %v1948_v58, %v762_v2  ;;  %v1001_v1 = vmul.f32 %v1950_v59, %v723_v35  ;;  %v1073_v8 = vmul.f32 %v1943_v55, %v762_v2  ;;  %v724_v21 = vsel %vm692_vm2, 0.0, %v704_v51 }
 0x11c   : > { %v839_v10 = vadd.f32 %v823_v52, %v787_v4  ;;  %v910_v53 = vadd.f32 %v894_v38, %v874_v56  ;;  %v743_v15 = vrot.slane %v639_v29, 1  ;;  %v788_v46 = vmul.f32 %v1911_v36, %v724_v21 }
 0x11d   : > { %v1017_v16 = vadd.f32 %v1001_v1, %v981_v6  ;;  %v824_v24 = vmul.f32 %v1913_v37, %v639_v29  ;;  %v895_v40 = vmul.f32 %v1946_v57, %v724_v21  ;;  %v931_v44 = vmul.f32 %v1941_v54, %v639_v29 }
 0x11e   : > { %v875_v28 = vadd.f32 %v859_v7, %v839_v10  ;;  %v946_v50 = vadd.f32 %v930_v41, %v910_v53  ;;  %v763_v30 = vsel %vm731_vm3, 0.0, %v743_v15  ;;  %v1002_v51 = vmul.f32 %v1950_v59, %v724_v21 }
 0x11f   : > { %v1053_v14 = vadd.f32 %v1037_v61, %v1017_v16  ;;  %v840_v56 = vadd.f32 %v824_v24, %v788_v46  ;;  %v860_v52 = vmul.f32 %v1922_v43, %v763_v30  ;;  %v967_v63 = vmul.f32 %v1948_v58, %v763_v30 }
 0x120   : > { %v982_v35 = vadd.f32 %v966_v20, %v946_v50  ;;  %v911_v2 = vadd.f32 %v895_v40, %v875_v28  ;;  %v1038_v6 = vmul.f32 %v1952_v60, %v639_v29  ;;  %v1074_v7 = vmul.f32 %v1943_v55, %v763_v30 }
 0x121   : > { %v2252_v4 = vadd.f32 %v1073_v8, %v1053_v14  ;;  %v876_v41 = vadd.f32 %v860_v52, %v840_v56  ;;  %v705_v38 = vrot.slane %v644_v9, 7  ;;  %v744_v61 = vrot.slane %v644_v9, 1 }
 0x122   : > { %v947_v1 = vadd.f32 %v931_v44, %v911_v2  ;;  %v1018_v10 = vadd.f32 %v1002_v51, %v982_v35  ;;  %v825_v53 = vmul.f32 %v1913_v37, %v644_v9  ;;  %v932_v20 = vmul.f32 %v1941_v54, %v644_v9 }
 0x123   : > { %v725_v15 = vsel %vm692_vm2, 0.0, %v705_v38  ;;  %v1039_v21 = vmul.f32 %v1952_v60, %v644_v9  ;;  %v706_v29 = vrot.slane %v2223_v5, 7  ;;  %v764_v46 = vsel %vm731_vm3, 0.0, %v744_v61 }
 0x124   : > { %v983_v8 = vadd.f32 %v967_v63, %v947_v1  ;;  %v1054_v16 = vadd.f32 %v1038_v6, %v1018_v10  ;;  %v789_v24 = vmul.f32 %v1911_v36, %v725_v15  ;;  %v861_v40 = vmul.f32 %v1922_v43, %v764_v46 }
 0x125   : > { %v896_v28 = vmul.f32 %v1946_v57, %v725_v15  ;;  %v968_v50 = vmul.f32 %v1948_v58, %v764_v46  ;;  %v1003_v30 = vmul.f32 %v1950_v59, %v725_v15  ;;  %v1075_v14 = vmul.f32 %v1943_v55, %v764_v46 }
 0x126   : > { %v2268_v44 = vadd.f32 %v1074_v7, %v1054_v16  ;;  %v841_v9 = vadd.f32 %v825_v53, %v789_v24  ;;  %v726_v56 = vsel %vm692_vm2, 0.0, %v706_v29  ;;  %v745_v35 = vrot.slane %v2223_v5, 1 }
 0x127   : > { %v912_v52 = vadd.f32 %v896_v28, %v876_v41  ;;  %v1019_v63 = vadd.f32 %v1003_v30, %v983_v8  ;;  %v790_v2 = vmul.f32 %v1911_v36, %v726_v56  ;;  %v826_v6 = vmul.f32 %v1913_v37, %v2223_v5 }
 0x128   : > { %v877_v51 = vadd.f32 %v861_v40, %v841_v9  ;;  %v897_v38 = vmul.f32 %v1946_v57, %v726_v56  ;;  %v933_v7 = vmul.f32 %v1941_v54, %v2223_v5  ;;  %v765_v61 = vsel %vm731_vm3, 0.0, %v745_v35 }
 0x129   : > { %v948_v1 = vadd.f32 %v932_v20, %v912_v52  ;;  %v1055_v10 = vadd.f32 %v1039_v21, %v1019_v63  ;;  %v1004_v41 = vmul.f32 %v1950_v59, %v726_v56  ;;  %v842_v53 = vadd.f32 %v826_v6, %v790_v2 }
 0x12a   : > { %v862_v15 = vmul.f32 %v1922_v43, %v765_v61  ;;  %v913_v36 = vadd.f32 %v897_v38, %v877_v51  ;;  %v969_v29 = vmul.f32 %v1948_v58, %v765_v61  ;;  %v1040_v57 = vmul.f32 %v1952_v60, %v2223_v5 }
 0x12b   : > { %v984_v8 = vadd.f32 %v968_v50, %v948_v1  ;;  %v1091_v37 = vadd.f32 %v1075_v14, %v1055_v10  ;;  %v1076_v54 = vmul.f32 %v1943_v55, %v765_v61  ;;  %v2290_v31 = vadd.f32 %v2095_v34, %v2033_v47 }
 0x12c   : > { %v878_v20 = vadd.f32 %v862_v15, %v842_v53  ;;  %v949_v21 = vadd.f32 %v933_v7, %v913_v36  ;;  %v2294_v59 = vadd.f32 %v2095_v34, %v2056_v23  ;;  %v1170_v58 = vadd.f32 %v2133_v18, %v2102_v39 }
 0x12d   : > { %v1020_v43 = vadd.f32 %v1004_v41, %v984_v8  ;;  %v1171_v16 = vadd.f32 %v2177_v3, %v2152_v27  ;;  %v2302_v55 = vadd.f32 %v2095_v34, %v2171_v45  ;;  %v1120_v47 = vmul.f32 %v2290_v31, %v2290_v31 }
 0x12e   : > { %v914_v60 = vadd.f32 %v1983_v22, %v878_v20  ;;  %v985_v5 = vadd.f32 %v969_v29, %v949_v21  ;;  %v1121_v23 = vmul.f32 %v2294_v59, %v2294_v59  ;;  %v1186_v24 = vmul.f32 0.7978846, %v1170_v58 }
 0x12f   : > { %v1056_v46 = vadd.f32 %v1040_v57, %v1020_v43  ;;  %v1187_v40 = vmul.f32 0.7978846, %v1171_v16  ;;  %v2311_v18 = vadd.f32 %v2095_v34, %v2199_v33  ;;  %v1136_v22 = vmul.f32 %v1120_v47, %v2290_v31 }
 0x130   : > { %v950_v3 = vadd.f32 %v1970_v11, %v914_v60  ;;  %v1021_v45 = vadd.f32 %v1999_v32, %v985_v5  ;;  %v1137_v28 = vmul.f32 %v1121_v23, %v2294_v59  ;;  %1709 = vtanh.f32 %v1186_v24 }
 0x131   : > { %v1092_v50 = vadd.f32 %v1076_v54, %v1056_v46  ;;  %v1124_v30 = vmul.f32 %v2302_v55, %v2302_v55  ;;  %v1125_v9 = vmul.f32 %v2311_v18, %v2311_v18  ;;  %v1152_v56 = vmul.f32 0.044715, %v1136_v22 }
 0x132   : > { %v986_v14 = vadd.f32 %v1991_v26, %v950_v3  ;;  %v1057_v33 = vadd.f32 %v1973_v12, %v1021_v45  ;;  %v1153_v11 = vmul.f32 0.044715, %v1137_v28  ;;  %1711 = vtanh.f32 %v1187_v40 }
 0x133   : > { %v1140_v32 = vmul.f32 %v1124_v30, %v2302_v55  ;;  %v1141_v52 = vmul.f32 %v1125_v9, %v2311_v18  ;;  %v2327_v63 = vadd.f32 %v2095_v34, %v2214_v42  ;;  %v1168_v35 = vadd.f32 %v1152_v56, %v2290_v31 }
 0x134   : > { %v1169_v2 = vadd.f32 %v1153_v11, %v2294_v59  ;;  %v2333_v26 = vadd.f32 %v2095_v34, %v2235_v49  ;;  %v2337_v12 = vadd.f32 %v2095_v34, %v2252_v4  ;;  %v2343_v42 = vadd.f32 %v2095_v34, %v2268_v44 }
 0x135   : > { %v1156_v51 = vmul.f32 0.044715, %v1140_v32  ;;  %v1157_v6 = vmul.f32 0.044715, %v1141_v52  ;;  %v1126_v38 = vmul.f32 %v2327_v63, %v2327_v63  ;;  %v1184_v7 = vmul.f32 0.7978846, %v1168_v35 }
 0x136   : > { %v1185_v1 = vmul.f32 0.7978846, %v1169_v2  ;;  %v1127_v10 = vmul.f32 %v2333_v26, %v2333_v26  ;;  %v1128_v49 = vmul.f32 %v2337_v12, %v2337_v12  ;;  %v1129_v53 = vmul.f32 %v2343_v42, %v2343_v42 }
 0x137   : > { %v1172_v4 = vadd.f32 %v1156_v51, %v2302_v55  ;;  %v1173_v61 = vadd.f32 %v1157_v6, %v2311_v18  ;;  %v1142_v41 = vmul.f32 %v1126_v38, %v2327_v63  ;;  %1713 = vtanh.f32 %v1184_v7 }
 0x138   : > { %v1143_v44 = vmul.f32 %v1127_v10, %v2333_v26  ;;  %v1144_v15 = vmul.f32 %v1128_v49, %v2337_v12  ;;  %v2357_v36 = vadd.f32 %v2095_v34, %v1091_v37  ;;  %1715 = vtanh.f32 %v1185_v1 }
 0x139   : > { %v1188_v29 = vmul.f32 0.7978846, %v1172_v4  ;;  %v1189_v8 = vmul.f32 0.7978846, %v1173_v61  ;;  %v1158_v57 = vmul.f32 0.044715, %v1142_v41  ;;  %v1145_v20 = vmul.f32 %v1129_v53, %v2343_v42 }
 0x13a   : > { %v1159_v54 = vmul.f32 0.044715, %v1143_v44  ;;  %v1160_v21 = vmul.f32 0.044715, %v1144_v15  ;;  %v2361_v43 = vadd.f32 %v2095_v34, %v1092_v50  ;;  %v1130_v16 = vmul.f32 %v2357_v36, %v2357_v36 }
 0x13b   : > { %1717 = vtanh.f32 %v1188_v29  ;;  %v1174_v58 = vadd.f32 %v1158_v57, %v2327_v63  ;;  %v1022_v37 = vadd.f32 %v2054_v17, %v986_v14  ;;  %v1161_v5 = vmul.f32 0.044715, %v1145_v20 }
 0x13c   : > { %1719 = vtanh.f32 %v1189_v8  ;;  %v1175_v60 = vadd.f32 %v1159_v54, %v2333_v26  ;;  %v1176_v47 = vadd.f32 %v1160_v21, %v2337_v12  ;;  %v1131_v46 = vmul.f32 %v2361_v43, %v2361_v43 }
 0x13d   : > { %v1190_v23 = vmul.f32 0.7978846, %v1174_v58  ;;  %v1146_v24 = vmul.f32 %v1130_v16, %v2357_v36  ;;  %v1058_v40 = vadd.f32 %v2051_v13, %v1022_v37  ;;  %v1710_v3 = vpop.eup %1709  ;;  %v1177_v22 = vadd.f32 %v1161_v5, %v2343_v42 }
 0x13e   : > { %v1191_v45 = vmul.f32 0.7978846, %v1175_v60  ;;  %v1192_v28 = vmul.f32 0.7978846, %v1176_v47  ;;  %v1093_v17 = vadd.f32 %v2012_v62, %v1057_v33  ;;  %v1096_v50 = vadd.f32 %v1955_v0, %v2139_v48 }
 0x13f   : > { %1721 = vtanh.f32 %v1190_v23  ;;  %v1147_v30 = vmul.f32 %v1131_v46, %v2361_v43  ;;  %v1162_v9 = vmul.f32 0.044715, %v1146_v24  ;;  %v1712_v14 = vpop.eup %1711  ;;  %v1193_v56 = vmul.f32 0.7978846, %v1177_v22 }
 0x140   : > { %1723 = vtanh.f32 %v1191_v45  ;;  %v1094_v11 = vadd.f32 %v2059_v25, %v1058_v40  ;;  %v2380_v13 = vadd.f32 %v2095_v34, %v1093_v17  ;;  %v1218_v32 = vadd.f32 1.0, %v1710_v3 }
 0x141   : > { %v1219_v52 = vadd.f32 1.0, %v1712_v14  ;;  %1725 = vtanh.f32 %v1192_v28  ;;  %v1163_v35 = vmul.f32 0.044715, %v1147_v30  ;;  %v1178_v62 = vadd.f32 %v1162_v9, %v2357_v36 }
 0x142   : > { %1727 = vtanh.f32 %v1193_v56  ;;  %v2384_v0 = vadd.f32 %v2095_v34, %v1094_v11  ;;  %v1132_v48 = vmul.f32 %v2380_v13, %v2380_v13  ;;  %v2390_v25 = vadd.f32 %v2095_v34, %v1096_v50 }
 0x143   : > { %v1235_v33 = vmul.f32 0.5, %v1219_v52  ;;  %v1179_v2 = vadd.f32 %v1163_v35, %v2361_v43  ;;  %v1194_v51 = vmul.f32 0.7978846, %v1178_v62  ;;  %v1134_v7 = vmul.f32 %v2125_v19, %v2125_v19 }
 0x144   : > { %v1133_v6 = vmul.f32 %v2384_v0, %v2384_v0  ;;  %v1148_v38 = vmul.f32 %v1132_v48, %v2380_v13  ;;  %v1714_v1 = vpop.eup %1713  ;;  %v1234_v10 = vmul.f32 0.5, %v1218_v32  ;;  %v1135_v4 = vmul.f32 %v2390_v25, %v2390_v25 }
 0x145   : > { %v1195_v49 = vmul.f32 0.7978846, %v1179_v2  ;;  %v1716_v61 = vpop.eup %1715  ;;  %v1216_v41 = vadd.f32 1.0, %v1714_v1  ;;  %1729 = vtanh.f32 %v1194_v51  ;;  %v1251_v15 = vmul.f32 %v1235_v33, %v2152_v27 }
 0x146   : > { %v1149_v34 = vmul.f32 %v1133_v6, %v2384_v0  ;;  %v1164_v53 = vmul.f32 0.044715, %v1148_v38  ;;  %v1217_v44 = vadd.f32 1.0, %v1716_v61  ;;  %v1150_v29 = vmul.f32 %v1134_v7, %v2125_v19 }
 0x147   : > { %1731 = vtanh.f32 %v1195_v49  ;;  %v1232_v57 = vmul.f32 0.5, %v1216_v41  ;;  %v1151_v21 = vmul.f32 %v1135_v4, %v2390_v25  ;;  %v1250_v37 = vmul.f32 %v1234_v10, %v2102_v39 }
 0x148   : > { %v1718_v8 = vpop.eup %1717  ;;  %v1165_v54 = vmul.f32 0.044715, %v1149_v34  ;;  %v1180_v20 = vadd.f32 %v1164_v53, %v2380_v13  ;;  %v1233_v16 = vmul.f32 0.5, %v1217_v44  ;;  %v1166_v5 = vmul.f32 0.044715, %v1150_v29 }
 0x149   : > { %v1720_v58 = vpop.eup %1719  ;;  %v1220_v60 = vadd.f32 1.0, %v1718_v8  ;;  %v1248_v47 = vmul.f32 %v1232_v57, %v2290_v31  ;;  %v1167_v3 = vmul.f32 0.044715, %v1151_v21  ;;  %v1265_v28 = vpack.c.bf16 %v1251_v15, %v1250_v37 }
 0x14a   : > { %v1221_v23 = vadd.f32 1.0, %v1720_v58  ;;  %v1181_v27 = vadd.f32 %v1165_v54, %v2384_v0  ;;  %v1196_v46 = vmul.f32 0.7978846, %v1180_v20  ;;  %v1249_v24 = vmul.f32 %v1233_v16, %v2294_v59 }
 0x14b   : > { %v1236_v40 = vmul.f32 0.5, %v1220_v60  ;;  %v1182_v45 = vadd.f32 %v1166_v5, %v2125_v19  ;;  %v1183_v14 = vadd.f32 %v1167_v3, %v2390_v25 }
 0x14c   : > { %v1722_v22 = vpop.eup %1721  ;;  %v1237_v17 = vmul.f32 0.5, %v1221_v23  ;;  %v1197_v50 = vmul.f32 0.7978846, %v1181_v27  ;;  %1733 = vtanh.f32 %v1196_v46  ;;  %v1264_v30 = vpack.c.bf16 %v1249_v24, %v1248_v47  ;;  %v1581_v46 = vld [vmem:[%s2488_s8] ss:$0 sm:$0xff] }
 0x14d   : > { %v1724_v39 = vpop.eup %1723  ;;  %v1252_v9 = vmul.f32 %v1236_v40, %v2302_v55  ;;  %v1222_v31 = vadd.f32 1.0, %v1722_v22  ;;  %v1198_v32 = vmul.f32 0.7978846, %v1182_v45  ;;  %v1199_v48 = vmul.f32 0.7978846, %v1183_v14 }
 0x14e   : > { %v1726_v56 = vpop.eup %1725  ;;  %v1253_v11 = vmul.f32 %v1237_v17, %v2311_v18  ;;  %v1223_v59 = vadd.f32 1.0, %v1724_v39  ;;  %1735 = vtanh.f32 %v1197_v50  ;;  %1662 = vmatprep.mubr.msk.bf16.mxu1 %vm1295_vm4, %v1264_v30 }
 0x14f   : > { %v1728_v52 = vpop.eup %1727  ;;  %v1238_v35 = vmul.f32 0.5, %v1222_v31  ;;  %v1224_v62 = vadd.f32 1.0, %v1726_v56  ;;  %1663 = vmatmul.mubr.msk.bf16.vlgmr.msra.gmra.mxu1 %vm1295_vm4, %v1265_v28  ;;  %1737 = vtanh.f32 %v1198_v32 }
 0x150   : > { %v1266_v33 = vpack.c.bf16 %v1253_v11, %v1252_v9  ;;  %v1239_v2 = vmul.f32 0.5, %v1223_v59  ;;  %v1225_v55 = vadd.f32 1.0, %v1728_v52  ;;  %1739 = vtanh.f32 %v1199_v48 }
 0x151   : > { %v1240_v51 = vmul.f32 0.5, %v1224_v62  ;;  %v1254_v18 = vmul.f32 %v1238_v35, %v2327_v63 }
 0x152   : > { %1666 = vmatprep.mubr.msk.bf16.mxu1 %vm1295_vm4, %v1266_v33  ;;  %v1255_v6 = vmul.f32 %v1239_v2, %v2333_v26  ;;  %v1241_v38 = vmul.f32 0.5, %v1225_v55  ;;  %v1730_v7 = vpop.eup %1729 }
 0x153   : > { %v1256_v49 = vmul.f32 %v1240_v51, %v2337_v12  ;;  %v1226_v61 = vadd.f32 1.0, %v1730_v7 }
 0x154   : > { %v1732_v1 = vpop.eup %1731  ;;  %v1267_v10 = vpack.c.bf16 %v1255_v6, %v1254_v18  ;;  %v1257_v4 = vmul.f32 %v1241_v38, %v2343_v42 }
 0x155   : > { %v1227_v41 = vadd.f32 1.0, %v1732_v1  ;;  %v1242_v53 = vmul.f32 0.5, %v1226_v61 }
 0x156   : > { %v1268_v34 = vpack.c.bf16 %v1257_v4, %v1256_v49 }
 0x157   : > { %v1243_v44 = vmul.f32 0.5, %v1227_v41  ;;  %1667 = vmatmul.mubr.msk.bf16.gmra.mxu1 %vm1295_vm4, %v1267_v10  ;;  %v1258_v26 = vmul.f32 %v1242_v53, %v2357_v36 }
 0x158   : > { %1670 = vmatprep.mubr.msk.bf16.mxu1 %vm1295_vm4, %v1268_v34 }
 0x159   : > { %v1734_v15 = vpop.eup %1733  ;;  %v1259_v63 = vmul.f32 %v1243_v44, %v2361_v43 }
 0x15a   : > { %v1228_v29 = vadd.f32 1.0, %v1734_v15 }
 0x15b   : > { %v1736_v8 = vpop.eup %1735  ;;  %v1269_v57 = vpack.c.bf16 %v1259_v63, %v1258_v26 }
 0x15c   : > { %v1229_v12 = vadd.f32 1.0, %v1736_v8  ;;  %v1244_v54 = vmul.f32 0.5, %v1228_v29  ;;  %v1738_v42 = vpop.eup %1737 }
 0x15d   : > { %v1740_v20 = vpop.eup %1739  ;;  %v1230_v58 = vadd.f32 1.0, %v1738_v42 }
 0x15e   : > { %v1245_v21 = vmul.f32 0.5, %v1229_v12  ;;  %v1231_v16 = vadd.f32 1.0, %v1740_v20  ;;  %v1260_v37 = vmul.f32 %v1244_v54, %v2380_v13 }
 0x15f   : > { %1671 = vmatmul.mubr.msk.bf16.gmra.mxu1 %vm1295_vm4, %v1269_v57  ;;  %v1246_v43 = vmul.f32 0.5, %v1230_v58 }
 0x160   : > { %v1261_v60 = vmul.f32 %v1245_v21, %v2384_v0  ;;  %v1247_v5 = vmul.f32 0.5, %v1231_v16 }
 0x161   : > { %v1262_v47 = vmul.f32 %v1246_v43, %v2125_v19 }
 0x162   : > { %v1270_v36 = vpack.c.bf16 %v1261_v60, %v1260_v37  ;;  %v1263_v23 = vmul.f32 %v1247_v5, %v2390_v25 }
 0x164   : > { %1674 = vmatprep.mubr.msk.bf16.mxu1 %vm1295_vm4, %v1270_v36  ;;  %v1271_v27 = vpack.c.bf16 %v1263_v23, %v1262_v47 }
 0x167   : > { %1675 = vmatmul.mubr.msk.bf16.gmra.mxu1 %vm1295_vm4, %v1271_v27 }
 0x20f   : > { %v1664_v19 = vpop.f32.mrf.mxu1 }
 0x210   : > { %v1363_v13 = vadd.f32 %v1664_v19, %v1581_v46 }
 0x211   : > { %v1354_v0 = vpop.f32.mrf.mxu1 }
 0x212   : > { %1419 = vst.msk [vmem:[%s2437_s27 + $0x10] sm:$0xff] %vm533_vm1, %v1363_v13  ;;  %v1355_v25 = vadd.f32 %v1581_v46, %v1354_v0 }
 0x213   : > { %v1665_v24 = vpop.f32.mrf.mxu1 }
 0x214   : > { %1417 = vst.msk [vmem:[%s2437_s27] sm:$0xff] %vm533_vm1, %v1355_v25  ;;  %v1366_v40 = vadd.f32 %v1665_v24, %v1581_v46 }
 0x215   : > { %v1357_v3 = vpop.f32.mrf.mxu1 }
 0x216   : > { %1420 = vst.msk [vmem:[%s2437_s27 + $0x18] sm:$0xff] %vm533_vm1, %v1366_v40  ;;  %v1358_v45 = vadd.f32 %v1581_v46, %v1357_v3 }
 0x217   : > { %v1668_v22 = vpop.f32.mrf.mxu1 }
 0x218   : > { %1418 = vst.msk [vmem:[%s2437_s27 + $0x8] sm:$0xff] %vm533_vm1, %v1358_v45  ;;  %v1379_v28 = vadd.f32 %v1668_v22, %v1581_v46 }
 0x219   : > { %v1370_v17 = vpop.f32.mrf.mxu1 }
 0x21a   : > { %1423 = vst.msk [vmem:[%s2437_s27 + $0x30] sm:$0xff] %vm533_vm1, %v1379_v28  ;;  %v1371_v50 = vadd.f32 %v1581_v46, %v1370_v17 }
 0x21b   : > { %v1669_v39 = vpop.f32.mrf.mxu1 }
 0x21c   : > { %1421 = vst.msk [vmem:[%s2437_s27 + $0x20] sm:$0xff] %vm533_vm1, %v1371_v50  ;;  %v1382_v30 = vadd.f32 %v1669_v39, %v1581_v46 }
 0x21d   : > { %v1373_v9 = vpop.f32.mrf.mxu1 }
 0x21e   : > { %1424 = vst.msk [vmem:[%s2437_s27 + $0x38] sm:$0xff] %vm533_vm1, %v1382_v30  ;;  %v1374_v31 = vadd.f32 %v1581_v46, %v1373_v9 }
 0x21f   : > { %v1672_v14 = vpop.f32.mrf.mxu1 }
 0x220   : > { %1422 = vst.msk [vmem:[%s2437_s27 + $0x28] sm:$0xff] %vm533_vm1, %v1374_v31  ;;  %v1395_v56 = vadd.f32 %v1672_v14, %v1581_v46 }
 0x221   : > { %v1386_v11 = vpop.f32.mrf.mxu1 }
 0x222   : > { %1427 = vst.msk [vmem:[%s2437_s27 + $0x50] sm:$0xff] %vm533_vm1, %v1395_v56  ;;  %v1387_v59 = vadd.f32 %v1581_v46, %v1386_v11 }
 0x223   : > { %v1673_v32 = vpop.f32.mrf.mxu1 }
 0x224   : > { %1425 = vst.msk [vmem:[%s2437_s27 + $0x40] sm:$0xff] %vm533_vm1, %v1387_v59  ;;  %v1398_v52 = vadd.f32 %v1673_v32, %v1581_v46 }
 0x225   : > { %v1389_v35 = vpop.f32.mrf.mxu1 }
 0x226   : > { %1428 = vst.msk [vmem:[%s2437_s27 + $0x58] sm:$0xff] %vm533_vm1, %v1398_v52  ;;  %v1390_v62 = vadd.f32 %v1581_v46, %v1389_v35 }
 0x227   : > { %v1676_v48 = vpop.f32.mrf.mxu1 }
 0x228   : > { %1426 = vst.msk [vmem:[%s2437_s27 + $0x48] sm:$0xff] %vm533_vm1, %v1390_v62  ;;  %v1411_v33 = vadd.f32 %v1676_v48, %v1581_v46 }
 0x229   : > { %v1402_v2 = vpop.f32.mrf.mxu1 }
 0x22a   : > { %1431 = vst.msk [vmem:[%s2437_s27 + $0x70] sm:$0xff] %vm533_vm1, %v1411_v33  ;;  %v1403_v55 = vadd.f32 %v1581_v46, %v1402_v2 }
 0x22b   : > { %v1677_v51 = vpop.f32.mrf.mxu1 }
 0x22c   : > { %1429 = vst.msk [vmem:[%s2437_s27 + $0x60] sm:$0xff] %vm533_vm1, %v1403_v55  ;;  %v1414_v18 = vadd.f32 %v1677_v51, %v1581_v46 }
 0x22d   : > { %v1405_v6 = vpop.f32.mrf.mxu1 }
 0x22e   : > { %1432 = vst.msk [vmem:[%s2437_s27 + $0x78] sm:$0xff] %vm533_vm1, %v1414_v18  ;;  %v1406_v38 = vadd.f32 %v1581_v46, %v1405_v6 }
 0x230   : > { %1430 = vst.msk [vmem:[%s2437_s27 + $0x68] sm:$0xff] %vm533_vm1, %v1406_v38 }
 0x231 PF: > { %s19_s11 = sadd.s32 1, %s1763_s11   ;;  %s2490_s30 = smov %s1759_s10 }
 0x232   : > { %p16_p5 = scmp.ge.s32.totalorder %s19_s11, 4   ;;  %s2491_s10 = smov %s2493_s12 }
 0x234   :  { %18 = sbr.rel (!%p16_p5) target bundleno = 2 (0x2), region = 92 }

</bundles_post_ra>
